<compile_context>
chip_gen: v7x
topology: tpu7x:2x2x1
jax: 0.10.0
libtpu: 0.0.40
codegen_flags: <defaults>
</compile_context>

<pallas_src>
import functools

import jax
import jax.numpy as jnp
from jax import lax
from jax.experimental import pallas as pl
from jax.experimental.pallas import tpu as pltpu

_VMEM_LIMIT = 48 * 1024 * 1024  # < v7x 64 MiB physical, > 32 MiB scoped default


# ----------------------------------------------------------------------------
# Kernels
# ----------------------------------------------------------------------------

def _block0_kernel(x_ref, w_ref, b_ref, o_ref, *, oh, ow):
    """Conv2d(k=4, s=2, p=1, bias=True) + LeakyReLU(0.2), one batch element.

    x_ref: (1, oh+1, ow+1, 4*Cin)  space-to-depth packed, pre-padded input
    w_ref: (2, 2, 4*Cin, F)        repacked conv weight
    b_ref: (1, F)                  bias (f32)
    o_ref: (1, F, oh*ow)           channel-major, lane-dense (oh*ow on lanes)
    """
    f = w_ref.shape[-1]
    rows = oh * ow
    acc = jnp.zeros((rows, f), jnp.float32)
    for a in range(2):
        for b in range(2):
            patch = x_ref[0, a:a + oh, b:b + ow, :]           # (oh, ow, 4*Cin)
            patch = patch.reshape(rows, patch.shape[-1])
            acc = acc + jnp.dot(patch, w_ref[a, b],
                                preferred_element_type=jnp.float32)
    y = acc + b_ref[...]
    y = jnp.where(y > 0.0, y, 0.2 * y)
    # Lane-dense store: spatial axis (multiple of 128) sits on lanes.
    o_ref[0] = jnp.transpose(y).astype(o_ref.dtype)


def _block1_predict_kernel(x_ref, w_ref, g_ref, be_ref, wp_ref, o_ref,
                           sum_scr, ssq_scr, *, n, oh, ow):
    """Conv2d(k=4,s=2,p=1,no-bias) + BatchNorm2d (training batch stats)
    + LeakyReLU(0.2) + full-spatial predict conv + Sigmoid.

    grid = (2, n):  axis 0 = pass (0: conv + BN statistics,
                                   1: normalize + predict),
                    axis 1 = batch element.  Both axes sequential ("arbitrary")
                    because the BN statistics accumulate across grid steps.

    x_ref : (1, oh+1, ow+1, 4*F0)  packed input for this batch element
    w_ref : (2, 2, 4*F0, F1)       repacked conv weight
    g_ref, be_ref : (1, F1)        BN gamma / beta (f32)
    wp_ref: (oh*ow, F1)            predict weight, rows = h*ow + w
    o_ref : (n, 1)                 logits; resident across the whole grid
    sum_scr, ssq_scr : (1, F1) f32 per-channel sum / sum-of-squares scratch
    """
    p = pl.program_id(0)
    i = pl.program_id(1)
    rows = oh * ow
    f1 = w_ref.shape[-1]

    @pl.when((p == 0) & (i == 0))
    def _init():
        sum_scr[...] = jnp.zeros_like(sum_scr)
        ssq_scr[...] = jnp.zeros_like(ssq_scr)

    # Per-sample conv (recomputed in pass 1: cheaper than keeping the
    # whole-batch conv output VMEM-resident; keeps per-step VMEM bounded).
    acc = jnp.zeros((rows, f1), jnp.float32)
    for a in range(2):
        for b in range(2):
            patch = x_ref[0, a:a + oh, b:b + ow, :]           # (oh, ow, 4*F0)
            patch = patch.reshape(rows, patch.shape[-1])
            acc = acc + jnp.dot(patch, w_ref[a, b],
                                preferred_element_type=jnp.float32)

    @pl.when(p == 0)
    def _stats():
        # Single-pass BN statistics folded into the conv pass.
        sum_scr[...] += jnp.sum(acc, axis=0, keepdims=True)
        ssq_scr[...] += jnp.sum(acc * acc, axis=0, keepdims=True)

    @pl.when(p == 1)
    def _normalize_predict():
        cnt = jnp.float32(n * rows)
        mean = sum_scr[...] / cnt
        var = ssq_scr[...] / cnt - mean * mean                # biased batch var
        z = (acc - mean) * lax.rsqrt(var + 1e-5)
        z = z * g_ref[...] + be_ref[...]
        z = jnp.where(z > 0.0, z, 0.2 * z)
        # Vectorized predict head: one multiply + reduction over all rows.
        s = jnp.sum(z * wp_ref[...].astype(jnp.float32), axis=1, keepdims=True)
        s = jnp.sum(s, axis=0, keepdims=True)                 # (1, 1)
        o_ref[pl.ds(i, 1), :] = jax.nn.sigmoid(s)


# ----------------------------------------------------------------------------
# XLA glue: space-to-depth packing (1x traffic) + weight repacking
# ----------------------------------------------------------------------------

def _space_to_depth(x):
    """(N, H, W, C), even H/W -> (N, H//2, W//2, 4C); channel order (di, dj, c)."""
    n, h, w, c = x.shape
    x = x.reshape(n, h // 2, 2, w // 2, 2, c)
    x = x.transpose(0, 1, 3, 2, 4, 5)
    return x.reshape(n, h // 2, w // 2, 4 * c)


def _pack_conv_input(x_nhwc):
    """pad=1 then space-to-depth: (N,H,W,C) -> (N, H//2+1, W//2+1, 4C)."""
    xp = jnp.pad(x_nhwc, ((0, 0), (1, 1), (1, 1), (0, 0)))
    return _space_to_depth(xp)


def _pack_conv_weight(w):
    """(O, C, 4, 4) OIHW -> (2, 2, 4C, O), matching the (di, dj, c) packing."""
    o, c, _, _ = w.shape
    w6 = w.reshape(o, c, 2, 2, 2, 2)            # (o, c, a, di, b, dj)
    w6 = w6.transpose(2, 4, 3, 5, 1, 0)          # (a, b, di, dj, c, o)
    return w6.reshape(2, 2, 4 * c, o)


# ----------------------------------------------------------------------------
# Parameter init (matches weights_init: conv ~N(0,.02), bn gamma ~N(1,.02))
# ----------------------------------------------------------------------------

def init_params(key, n_channels, filter_dim):
    k0, k1, k2 = jax.random.split(key, 3)
    return {
        "w0": 0.02 * jax.random.normal(k0, (filter_dim, n_channels, 4, 4),
                                       jnp.float32),
        "b0": jnp.zeros((filter_dim,), jnp.float32),
        "w1": 0.02 * jax.random.normal(k1, (2 * filter_dim, filter_dim, 4, 4),
                                       jnp.float32),
        "bn_g": 1.0 + 0.02 * jax.random.normal(k2, (2 * filter_dim,),
                                               jnp.float32),
        "bn_b": jnp.zeros((2 * filter_dim,), jnp.float32),
    }


def init_predict_params(key, filter_dim, n_blocks, s_h, s_w):
    return 0.02 * jax.random.normal(
        key, (1, filter_dim * 2 ** (n_blocks - 1), s_h, s_w), jnp.float32)


# ----------------------------------------------------------------------------
# Discriminator forward
# ----------------------------------------------------------------------------

@functools.partial(jax.jit, static_argnames=("use_bf16",))
def discriminator_forward(x_nchw, params, wp, *, use_bf16=True):
    n, c, h, w = x_nchw.shape
    assert h % 4 == 0 and w % 4 == 0, "packing assumes H, W divisible by 4"
    cdt = jnp.bfloat16 if use_bf16 else jnp.float32

    f0 = params["w0"].shape[0]
    f1 = params["w1"].shape[0]
    oh0, ow0 = h // 2, w // 2
    oh1, ow1 = oh0 // 2, ow0 // 2

    # Single layout change at the API boundary; NHWC everywhere inside.
    x = jnp.transpose(x_nchw, (0, 2, 3, 1))

    # ---- block 0: Conv(4,2,1,bias) + LeakyReLU, gridded over batch ----------
    xp0 = _pack_conv_input(x).astype(cdt)                  # (N, oh0+1, ow0+1, 4C)
    w0 = _pack_conv_weight(params["w0"]).astype(cdt)       # (2, 2, 4C, f0)
    b0 = params["b0"].reshape(1, f0)
    y0 = pl.pallas_call(
        functools.partial(_block0_kernel, oh=oh0, ow=ow0),
        grid=(n,),
        out_shape=jax.ShapeDtypeStruct((n, f0, oh0 * ow0), cdt),
        in_specs=[
            pl.BlockSpec((1, oh0 + 1, ow0 + 1, 4 * c), lambda i: (i, 0, 0, 0)),
            pl.BlockSpec((2, 2, 4 * c, f0), lambda i: (0, 0, 0, 0)),
            pl.BlockSpec((1, f0), lambda i: (0, 0)),
        ],
        out_specs=pl.BlockSpec((1, f0, oh0 * ow0), lambda i: (i, 0, 0)),
        compiler_params=pltpu.CompilerParams(
            dimension_semantics=("parallel",),
            vmem_limit_bytes=_VMEM_LIMIT),
    )(xp0, w0, b0)

    # ---- block 1 + BN + LeakyReLU + predict + sigmoid (two-pass gridded) ----
    # TODO(synk): fuse this repack into block 0's output layout to drop the
    # extra HBM round trip of y0 at production image sizes.
    y0_nhwc = jnp.transpose(y0.reshape(n, f0, oh0, ow0), (0, 2, 3, 1))
    xp1 = _pack_conv_input(y0_nhwc)                        # (N, oh1+1, ow1+1, 4*f0)
    w1 = _pack_conv_weight(params["w1"]).astype(cdt)       # (2, 2, 4*f0, f1)
    gamma = params["bn_g"].reshape(1, f1)
    beta = params["bn_b"].reshape(1, f1)
    wp2 = wp[0].transpose(1, 2, 0).reshape(oh1 * ow1, f1).astype(cdt)

    out = pl.pallas_call(
        functools.partial(_block1_predict_kernel, n=n, oh=oh1, ow=ow1),
        grid=(2, n),
        out_shape=jax.ShapeDtypeStruct((n, 1), jnp.float32),
        in_specs=[
            pl.BlockSpec((1, oh1 + 1, ow1 + 1, 4 * f0),
                         lambda p, i: (i, 0, 0, 0)),
            pl.BlockSpec((2, 2, 4 * f0, f1), lambda p, i: (0, 0, 0, 0)),
            pl.BlockSpec((1, f1), lambda p, i: (0, 0)),
            pl.BlockSpec((1, f1), lambda p, i: (0, 0)),
            pl.BlockSpec((oh1 * ow1, f1), lambda p, i: (0, 0)),
        ],
        out_specs=pl.BlockSpec((n, 1), lambda p, i: (0, 0)),
        scratch_shapes=[pltpu.VMEM((1, f1), jnp.float32),
                        pltpu.VMEM((1, f1), jnp.float32)],
        compiler_params=pltpu.CompilerParams(
            dimension_semantics=("arbitrary", "arbitrary"),
            vmem_limit_bytes=_VMEM_LIMIT),
    )(xp1, w1, gamma, beta, wp2)

    return out.reshape(n)


# ----------------------------------------------------------------------------
# Pure-JAX reference (lax.conv) for verification
# ----------------------------------------------------------------------------

def _leaky(x):
    return jnp.where(x > 0, x, 0.2 * x)


def reference_forward(x, params, wp):
    dn = ("NCHW", "OIHW", "NCHW")
    prec = lax.Precision.HIGHEST
    y = lax.conv_general_dilated(x, params["w0"], (2, 2), [(1, 1), (1, 1)],
                                 dimension_numbers=dn, precision=prec)
    y = _leaky(y + params["b0"].reshape(1, -1, 1, 1))
    y = lax.conv_general_dilated(y, params["w1"], (2, 2), [(1, 1), (1, 1)],
                                 dimension_numbers=dn, precision=prec)
    mean = y.mean(axis=(0, 2, 3), keepdims=True)
    var = ((y - mean) ** 2).mean(axis=(0, 2, 3), keepdims=True)
    y = (y - mean) * lax.rsqrt(var + 1e-5)
    y = _leaky(y * params["bn_g"].reshape(1, -1, 1, 1)
               + params["bn_b"].reshape(1, -1, 1, 1))
    y = lax.conv_general_dilated(y, wp, (1, 1), [(0, 0), (0, 0)],
                                 dimension_numbers=dn, precision=prec)
    return jax.nn.sigmoid(y.reshape(y.shape[0]))


# ----------------------------------------------------------------------------

if __name__ == "__main__":
    # Small config: image_size=(4, 32, 32), n_blocks=2, filter_dim=8
    N, C, H, W = 2, 4, 32, 32
    FILTER_DIM = 8
    N_BLOCKS = 2

    key = jax.random.PRNGKey(0)
    kx, kp, kpred = jax.random.split(key, 3)

    x = jax.random.normal(kx, (N, C, H, W), jnp.float32)

    # conv_out_size_same applied n_blocks times: 32 -> 16 -> 8
    s_h, s_w = H, W
    for _ in range(N_BLOCKS):
        s_h = -(-s_h // 2)
        s_w = -(-s_w // 2)

    params = init_params(kp, C, FILTER_DIM)
    wp = init_predict_params(kpred, FILTER_DIM, N_BLOCKS, s_h, s_w)

    ref = jax.block_until_ready(reference_forward(x, params, wp))

    # f32 storage/MXU-input path (tight-ish check against the XLA reference).
    out_f32 = jax.block_until_ready(
        discriminator_forward(x, params, wp, use_bf16=False))
    assert out_f32.shape == (N,), f"unexpected output shape {out_f32.shape}"
    assert jnp.allclose(out_f32, ref, atol=5e-3, rtol=5e-3), (out_f32, ref)

    # bf16 storage/MXU-input path (default; f32 accumulate + f32 epilogue).
    out_bf16 = jax.block_until_ready(
        discriminator_forward(x, params, wp, use_bf16=True))
    assert out_bf16.shape == (N,), f"unexpected output shape {out_bf16.shape}"
    assert jnp.allclose(out_bf16, ref, atol=5e-2, rtol=5e-2), (out_bf16, ref)

    print("KERNEL_OK")
</pallas_src>

<mosaic_0001>
module attributes {stable_mosaic.version = 11 : i64} {
  func.func @_block0_kernel(%arg0: i32, %arg1: memref<1x17x17x16xf32, #tpu.memory_space<vmem>>, %arg2: memref<2x2x16x8xf32, #tpu.memory_space<vmem>>, %arg3: memref<1x8xf32, #tpu.memory_space<vmem>>, %arg4: memref<1x8x256xf32, #tpu.memory_space<vmem>>) attributes {dimension_semantics = [#tpu.dimension_semantics<parallel>], iteration_bounds = array<i64: 2>, scalar_prefetch = 0 : i64, scratch_operands = 0 : i64, tpu.core_type = #tpu.core_type<tc>, window_params = [{transform_indices = @transform_0, window_bounds = array<i64: 1, 17, 17, 16>}, {pipeline_mode = #tpu.pipeline_mode<synchronous>, transform_indices = @transform_1, window_bounds = array<i64: 2, 2, 16, 8>}, {pipeline_mode = #tpu.pipeline_mode<synchronous>, transform_indices = @transform_2, window_bounds = array<i64: 1, 8>}, {transform_indices = @transform_3, window_bounds = array<i64: 1, 8, 256>}]} {
    %cst = arith.constant 0.000000e+00 : f32
    %0 = vector.broadcast %cst : f32 to vector<256x8xf32>
    %c0 = arith.constant 0 : index
    %c0_0 = arith.constant 0 : index
    %c0_1 = arith.constant 0 : index
    %c0_2 = arith.constant 0 : index
    %1 = vector.load %arg1[%c0, %c0_0, %c0_1, %c0_2] : memref<1x17x17x16xf32, #tpu.memory_space<vmem>>, vector<1x16x16x16xf32>
    %2 = vector.shape_cast %1 : vector<1x16x16x16xf32> to vector<16x16x16xf32>
    %3 = vector.shape_cast %2 : vector<16x16x16xf32> to vector<256x16xf32>
    %c0_3 = arith.constant 0 : index
    %c0_4 = arith.constant 0 : index
    %c0_5 = arith.constant 0 : index
    %c0_6 = arith.constant 0 : index
    %4 = vector.load %arg2[%c0_3, %c0_4, %c0_5, %c0_6] : memref<2x2x16x8xf32, #tpu.memory_space<vmem>>, vector<1x1x16x8xf32>
    %5 = vector.shape_cast %4 : vector<1x1x16x8xf32> to vector<16x8xf32>
    %cst_7 = arith.constant dense<0.000000e+00> : vector<256x8xf32>
    %6 = tpu.matmul %3, %5, %cst_7 {dimension_numbers = #tpu.dot_dimension_numbers<[1], [0], [0], [1], [0, 0, 1, 1], [], []>} : vector<256x16xf32>, vector<16x8xf32>, vector<256x8xf32> -> vector<256x8xf32>
    %7 = arith.addf %0, %6 : vector<256x8xf32>
    %c0_8 = arith.constant 0 : index
    %c0_9 = arith.constant 0 : index
    %c1 = arith.constant 1 : index
    %c0_10 = arith.constant 0 : index
    %8 = vector.load %arg1[%c0_8, %c0_9, %c1, %c0_10] : memref<1x17x17x16xf32, #tpu.memory_space<vmem>>, vector<1x16x16x16xf32>
    %9 = vector.shape_cast %8 : vector<1x16x16x16xf32> to vector<16x16x16xf32>
    %10 = vector.shape_cast %9 : vector<16x16x16xf32> to vector<256x16xf32>
    %c0_11 = arith.constant 0 : index
    %c1_12 = arith.constant 1 : index
    %c0_13 = arith.constant 0 : index
    %c0_14 = arith.constant 0 : index
    %11 = vector.load %arg2[%c0_11, %c1_12, %c0_13, %c0_14] : memref<2x2x16x8xf32, #tpu.memory_space<vmem>>, vector<1x1x16x8xf32>
    %12 = vector.shape_cast %11 : vector<1x1x16x8xf32> to vector<16x8xf32>
    %cst_15 = arith.constant dense<0.000000e+00> : vector<256x8xf32>
    %13 = tpu.matmul %10, %12, %cst_15 {dimension_numbers = #tpu.dot_dimension_numbers<[1], [0], [0], [1], [0, 0, 1, 1], [], []>} : vector<256x16xf32>, vector<16x8xf32>, vector<256x8xf32> -> vector<256x8xf32>
    %14 = arith.addf %7, %13 : vector<256x8xf32>
    %c0_16 = arith.constant 0 : index
    %c1_17 = arith.constant 1 : index
    %c0_18 = arith.constant 0 : index
    %c0_19 = arith.constant 0 : index
    %15 = vector.load %arg1[%c0_16, %c1_17, %c0_18, %c0_19] : memref<1x17x17x16xf32, #tpu.memory_space<vmem>>, vector<1x16x16x16xf32>
    %16 = vector.shape_cast %15 : vector<1x16x16x16xf32> to vector<16x16x16xf32>
    %17 = vector.shape_cast %16 : vector<16x16x16xf32> to vector<256x16xf32>
    %c1_20 = arith.constant 1 : index
    %c0_21 = arith.constant 0 : index
    %c0_22 = arith.constant 0 : index
    %c0_23 = arith.constant 0 : index
    %18 = vector.load %arg2[%c1_20, %c0_21, %c0_22, %c0_23] : memref<2x2x16x8xf32, #tpu.memory_space<vmem>>, vector<1x1x16x8xf32>
    %19 = vector.shape_cast %18 : vector<1x1x16x8xf32> to vector<16x8xf32>
    %cst_24 = arith.constant dense<0.000000e+00> : vector<256x8xf32>
    %20 = tpu.matmul %17, %19, %cst_24 {dimension_numbers = #tpu.dot_dimension_numbers<[1], [0], [0], [1], [0, 0, 1, 1], [], []>} : vector<256x16xf32>, vector<16x8xf32>, vector<256x8xf32> -> vector<256x8xf32>
    %21 = arith.addf %14, %20 : vector<256x8xf32>
    %c0_25 = arith.constant 0 : index
    %c1_26 = arith.constant 1 : index
    %c1_27 = arith.constant 1 : index
    %c0_28 = arith.constant 0 : index
    %22 = vector.load %arg1[%c0_25, %c1_26, %c1_27, %c0_28] : memref<1x17x17x16xf32, #tpu.memory_space<vmem>>, vector<1x16x16x16xf32>
    %23 = vector.shape_cast %22 : vector<1x16x16x16xf32> to vector<16x16x16xf32>
    %24 = vector.shape_cast %23 : vector<16x16x16xf32> to vector<256x16xf32>
    %c1_29 = arith.constant 1 : index
    %c1_30 = arith.constant 1 : index
    %c0_31 = arith.constant 0 : index
    %c0_32 = arith.constant 0 : index
    %25 = vector.load %arg2[%c1_29, %c1_30, %c0_31, %c0_32] : memref<2x2x16x8xf32, #tpu.memory_space<vmem>>, vector<1x1x16x8xf32>
    %26 = vector.shape_cast %25 : vector<1x1x16x8xf32> to vector<16x8xf32>
    %cst_33 = arith.constant dense<0.000000e+00> : vector<256x8xf32>
    %27 = tpu.matmul %24, %26, %cst_33 {dimension_numbers = #tpu.dot_dimension_numbers<[1], [0], [0], [1], [0, 0, 1, 1], [], []>} : vector<256x16xf32>, vector<16x8xf32>, vector<256x8xf32> -> vector<256x8xf32>
    %28 = arith.addf %21, %27 : vector<256x8xf32>
    %c0_34 = arith.constant 0 : index
    %c0_35 = arith.constant 0 : index
    %29 = vector.load %arg3[%c0_34, %c0_35] : memref<1x8xf32, #tpu.memory_space<vmem>>, vector<1x8xf32>
    %30 = vector.broadcast %29 : vector<1x8xf32> to vector<256x8xf32>
    %31 = arith.addf %28, %30 : vector<256x8xf32>
    %cst_36 = arith.constant 0.000000e+00 : f32
    %32 = vector.broadcast %cst_36 : f32 to vector<256x8xf32>
    %33 = arith.cmpf ogt, %31, %32 : vector<256x8xf32>
    %cst_37 = arith.constant 2.000000e-01 : f32
    %34 = vector.broadcast %cst_37 : f32 to vector<256x8xf32>
    %35 = arith.mulf %34, %31 : vector<256x8xf32>
    %36 = arith.select %33, %31, %35 : vector<256x8xi1>, vector<256x8xf32>
    %37 = tpu.transpose %36, [1, 0] : vector<256x8xf32> -> vector<8x256xf32>
    %c0_38 = arith.constant 0 : index
    %c0_39 = arith.constant 0 : index
    %c0_40 = arith.constant 0 : index
    %38 = vector.load %arg4[%c0_38, %c0_39, %c0_40] : memref<1x8x256xf32, #tpu.memory_space<vmem>>, vector<1x8x256xf32>
    %39 = vector.shape_cast %38 : vector<1x8x256xf32> to vector<8x256xf32>
    %40 = vector.shape_cast %37 : vector<8x256xf32> to vector<1x8x256xf32>
    tpu.vector_store %arg4[%c0_38, %c0_39, %c0_40], %40 {strides = array<i32>} : memref<1x8x256xf32, #tpu.memory_space<vmem>>, vector<1x8x256xf32>,
    return
  }
  func.func @transform_0(%arg0: i32) -> (i32, i32, i32, i32) {
    %c0_i32 = arith.constant 0 : i32
    %c0_i32_0 = arith.constant 0 : i32
    %c0_i32_1 = arith.constant 0 : i32
    %c0_i32_2 = arith.constant 0 : i32
    return %arg0, %c0_i32, %c0_i32_0, %c0_i32_1 : i32, i32, i32, i32
  }
  func.func @transform_1(%arg0: i32) -> (i32, i32, i32, i32) {
    %c0_i32 = arith.constant 0 : i32
    %c0_i32_0 = arith.constant 0 : i32
    %c0_i32_1 = arith.constant 0 : i32
    %c0_i32_2 = arith.constant 0 : i32
    %c0_i32_3 = arith.constant 0 : i32
    return %c0_i32, %c0_i32_0, %c0_i32_1, %c0_i32_2 : i32, i32, i32, i32
  }
  func.func @transform_2(%arg0: i32) -> (i32, i32) {
    %c0_i32 = arith.constant 0 : i32
    %c0_i32_0 = arith.constant 0 : i32
    %c0_i32_1 = arith.constant 0 : i32
    return %c0_i32, %c0_i32_0 : i32, i32
  }
  func.func @transform_3(%arg0: i32) -> (i32, i32, i32) {
    %c0_i32 = arith.constant 0 : i32
    %c0_i32_0 = arith.constant 0 : i32
    %c0_i32_1 = arith.constant 0 : i32
    return %arg0, %c0_i32, %c0_i32_0 : i32, i32, i32
  }
}

module attributes {stable_mosaic.version = 11 : i64} {
  func.func @_block1_predict_kernel(%arg0: i32, %arg1: i32, %arg2: memref<1x9x9x32xf32, #tpu.memory_space<vmem>>, %arg3: memref<2x2x32x16xf32, #tpu.memory_space<vmem>>, %arg4: memref<1x16xf32, #tpu.memory_space<vmem>>, %arg5: memref<1x16xf32, #tpu.memory_space<vmem>>, %arg6: memref<64x16xf32, #tpu.memory_space<vmem>>, %arg7: memref<2x1xf32, #tpu.memory_space<vmem>>, %arg8: memref<1x16xf32, #tpu.memory_space<vmem>>, %arg9: memref<1x16xf32, #tpu.memory_space<vmem>>) attributes {dimension_semantics = [#tpu.dimension_semantics<arbitrary>, #tpu.dimension_semantics<arbitrary>], iteration_bounds = array<i64: 2, 2>, scalar_prefetch = 0 : i64, scratch_operands = 2 : i64, tpu.core_type = #tpu.core_type<tc>, window_params = [{transform_indices = @transform_0, window_bounds = array<i64: 1, 9, 9, 32>}, {pipeline_mode = #tpu.pipeline_mode<synchronous>, transform_indices = @transform_1, window_bounds = array<i64: 2, 2, 32, 16>}, {pipeline_mode = #tpu.pipeline_mode<synchronous>, transform_indices = @transform_2, window_bounds = array<i64: 1, 16>}, {pipeline_mode = #tpu.pipeline_mode<synchronous>, transform_indices = @transform_3, window_bounds = array<i64: 1, 16>}, {pipeline_mode = #tpu.pipeline_mode<synchronous>, transform_indices = @transform_4, window_bounds = array<i64: 64, 16>}, {pipeline_mode = #tpu.pipeline_mode<synchronous>, transform_indices = @transform_5, window_bounds = array<i64: 2, 1>}]} {
    %c0_i32 = arith.constant 0 : i32
    %0 = arith.cmpi eq, %arg0, %c0_i32 : i32
    %c0_i32_0 = arith.constant 0 : i32
    %1 = arith.cmpi eq, %arg1, %c0_i32_0 : i32
    %2 = arith.andi %0, %1 : i1
    %3 = arith.extui %2 : i1 to i32
    %c0_i32_1 = arith.constant 0 : i32
    %4 = arith.cmpi ne, %3, %c0_i32_1 : i32
    scf.if %4 {
      %cst_39 = arith.constant 0.000000e+00 : f32
      %40 = vector.broadcast %cst_39 : f32 to vector<1x16xf32>
      %c0_40 = arith.constant 0 : index
      %c0_41 = arith.constant 0 : index
      %41 = vector.load %arg8[%c0_40, %c0_41] : memref<1x16xf32, #tpu.memory_space<vmem>>, vector<1x16xf32>
      tpu.vector_store %arg8[%c0_40, %c0_41], %40 {strides = array<i32>} : memref<1x16xf32, #tpu.memory_space<vmem>>, vector<1x16xf32>,
      %cst_42 = arith.constant 0.000000e+00 : f32
      %42 = vector.broadcast %cst_42 : f32 to vector<1x16xf32>
      %c0_43 = arith.constant 0 : index
      %c0_44 = arith.constant 0 : index
      %43 = vector.load %arg9[%c0_43, %c0_44] : memref<1x16xf32, #tpu.memory_space<vmem>>, vector<1x16xf32>
      tpu.vector_store %arg9[%c0_43, %c0_44], %42 {strides = array<i32>} : memref<1x16xf32, #tpu.memory_space<vmem>>, vector<1x16xf32>,
    } else {
    }
    %cst = arith.constant 0.000000e+00 : f32
    %5 = vector.broadcast %cst : f32 to vector<64x16xf32>
    %c0 = arith.constant 0 : index
    %c0_2 = arith.constant 0 : index
    %c0_3 = arith.constant 0 : index
    %c0_4 = arith.constant 0 : index
    %6 = vector.load %arg2[%c0, %c0_2, %c0_3, %c0_4] : memref<1x9x9x32xf32, #tpu.memory_space<vmem>>, vector<1x8x8x32xf32>
    %7 = vector.shape_cast %6 : vector<1x8x8x32xf32> to vector<8x8x32xf32>
    %8 = vector.shape_cast %7 : vector<8x8x32xf32> to vector<64x32xf32>
    %c0_5 = arith.constant 0 : index
    %c0_6 = arith.constant 0 : index
    %c0_7 = arith.constant 0 : index
    %c0_8 = arith.constant 0 : index
    %9 = vector.load %arg3[%c0_5, %c0_6, %c0_7, %c0_8] : memref<2x2x32x16xf32, #tpu.memory_space<vmem>>, vector<1x1x32x16xf32>
    %10 = vector.shape_cast %9 : vector<1x1x32x16xf32> to vector<32x16xf32>
    %cst_9 = arith.constant dense<0.000000e+00> : vector<64x16xf32>
    %11 = tpu.matmul %8, %10, %cst_9 {dimension_numbers = #tpu.dot_dimension_numbers<[1], [0], [0], [1], [0, 0, 1, 1], [], []>} : vector<64x32xf32>, vector<32x16xf32>, vector<64x16xf32> -> vector<64x16xf32>
    %12 = arith.addf %5, %11 : vector<64x16xf32>
    %c0_10 = arith.constant 0 : index
    %c0_11 = arith.constant 0 : index
    %c1 = arith.constant 1 : index
    %c0_12 = arith.constant 0 : index
    %13 = vector.load %arg2[%c0_10, %c0_11, %c1, %c0_12] : memref<1x9x9x32xf32, #tpu.memory_space<vmem>>, vector<1x8x8x32xf32>
    %14 = vector.shape_cast %13 : vector<1x8x8x32xf32> to vector<8x8x32xf32>
    %15 = vector.shape_cast %14 : vector<8x8x32xf32> to vector<64x32xf32>
    %c0_13 = arith.constant 0 : index
    %c1_14 = arith.constant 1 : index
    %c0_15 = arith.constant 0 : index
    %c0_16 = arith.constant 0 : index
    %16 = vector.load %arg3[%c0_13, %c1_14, %c0_15, %c0_16] : memref<2x2x32x16xf32, #tpu.memory_space<vmem>>, vector<1x1x32x16xf32>
    %17 = vector.shape_cast %16 : vector<1x1x32x16xf32> to vector<32x16xf32>
    %cst_17 = arith.constant dense<0.000000e+00> : vector<64x16xf32>
    %18 = tpu.matmul %15, %17, %cst_17 {dimension_numbers = #tpu.dot_dimension_numbers<[1], [0], [0], [1], [0, 0, 1, 1], [], []>} : vector<64x32xf32>, vector<32x16xf32>, vector<64x16xf32> -> vector<64x16xf32>
    %19 = arith.addf %12, %18 : vector<64x16xf32>
    %c0_18 = arith.constant 0 : index
    %c1_19 = arith.constant 1 : index
    %c0_20 = arith.constant 0 : index
    %c0_21 = arith.constant 0 : index
    %20 = vector.load %arg2[%c0_18, %c1_19, %c0_20, %c0_21] : memref<1x9x9x32xf32, #tpu.memory_space<vmem>>, vector<1x8x8x32xf32>
    %21 = vector.shape_cast %20 : vector<1x8x8x32xf32> to vector<8x8x32xf32>
    %22 = vector.shape_cast %21 : vector<8x8x32xf32> to vector<64x32xf32>
    %c1_22 = arith.constant 1 : index
    %c0_23 = arith.constant 0 : index
    %c0_24 = arith.constant 0 : index
    %c0_25 = arith.constant 0 : index
    %23 = vector.load %arg3[%c1_22, %c0_23, %c0_24, %c0_25] : memref<2x2x32x16xf32, #tpu.memory_space<vmem>>, vector<1x1x32x16xf32>
    %24 = vector.shape_cast %23 : vector<1x1x32x16xf32> to vector<32x16xf32>
    %cst_26 = arith.constant dense<0.000000e+00> : vector<64x16xf32>
    %25 = tpu.matmul %22, %24, %cst_26 {dimension_numbers = #tpu.dot_dimension_numbers<[1], [0], [0], [1], [0, 0, 1, 1], [], []>} : vector<64x32xf32>, vector<32x16xf32>, vector<64x16xf32> -> vector<64x16xf32>
    %26 = arith.addf %19, %25 : vector<64x16xf32>
    %c0_27 = arith.constant 0 : index
    %c1_28 = arith.constant 1 : index
    %c1_29 = arith.constant 1 : index
    %c0_30 = arith.constant 0 : index
    %27 = vector.load %arg2[%c0_27, %c1_28, %c1_29, %c0_30] : memref<1x9x9x32xf32, #tpu.memory_space<vmem>>, vector<1x8x8x32xf32>
    %28 = vector.shape_cast %27 : vector<1x8x8x32xf32> to vector<8x8x32xf32>
    %29 = vector.shape_cast %28 : vector<8x8x32xf32> to vector<64x32xf32>
    %c1_31 = arith.constant 1 : index
    %c1_32 = arith.constant 1 : index
    %c0_33 = arith.constant 0 : index
    %c0_34 = arith.constant 0 : index
    %30 = vector.load %arg3[%c1_31, %c1_32, %c0_33, %c0_34] : memref<2x2x32x16xf32, #tpu.memory_space<vmem>>, vector<1x1x32x16xf32>
    %31 = vector.shape_cast %30 : vector<1x1x32x16xf32> to vector<32x16xf32>
    %cst_35 = arith.constant dense<0.000000e+00> : vector<64x16xf32>
    %32 = tpu.matmul %29, %31, %cst_35 {dimension_numbers = #tpu.dot_dimension_numbers<[1], [0], [0], [1], [0, 0, 1, 1], [], []>} : vector<64x32xf32>, vector<32x16xf32>, vector<64x16xf32> -> vector<64x16xf32>
    %33 = arith.addf %26, %32 : vector<64x16xf32>
    %c0_i32_36 = arith.constant 0 : i32
    %34 = arith.cmpi eq, %arg0, %c0_i32_36 : i32
    %35 = arith.extui %34 : i1 to i32
    %c0_i32_37 = arith.constant 0 : i32
    %36 = arith.cmpi ne, %35, %c0_i32_37 : i32
    scf.if %36 {
      %c0_39 = arith.constant 0 : index
      %c0_40 = arith.constant 0 : index
      %40 = vector.load %arg8[%c0_39, %c0_40] : memref<1x16xf32, #tpu.memory_space<vmem>>, vector<1x16xf32>
      %cst_41 = arith.constant dense<0.000000e+00> : vector<16xf32>
      %41 = vector.multi_reduction <add>, %33, %cst_41 [0] : vector<64x16xf32> to vector<16xf32>
      %42 = vector.shape_cast %41 : vector<16xf32> to vector<1x16xf32>
      %43 = arith.addf %40, %42 : vector<1x16xf32>
      %c0_42 = arith.constant 0 : index
      %c0_43 = arith.constant 0 : index
      %44 = vector.load %arg8[%c0_42, %c0_43] : memref<1x16xf32, #tpu.memory_space<vmem>>, vector<1x16xf32>
      tpu.vector_store %arg8[%c0_42, %c0_43], %43 {strides = array<i32>} : memref<1x16xf32, #tpu.memory_space<vmem>>, vector<1x16xf32>,
      %c0_44 = arith.constant 0 : index
      %c0_45 = arith.constant 0 : index
      %45 = vector.load %arg9[%c0_44, %c0_45] : memref<1x16xf32, #tpu.memory_space<vmem>>, vector<1x16xf32>
      %46 = arith.mulf %33, %33 : vector<64x16xf32>
      %cst_46 = arith.constant dense<0.000000e+00> : vector<16xf32>
      %47 = vector.multi_reduction <add>, %46, %cst_46 [0] : vector<64x16xf32> to vector<16xf32>
      %48 = vector.shape_cast %47 : vector<16xf32> to vector<1x16xf32>
      %49 = arith.addf %45, %48 : vector<1x16xf32>
      %c0_47 = arith.constant 0 : index
      %c0_48 = arith.constant 0 : index
      %50 = vector.load %arg9[%c0_47, %c0_48] : memref<1x16xf32, #tpu.memory_space<vmem>>, vector<1x16xf32>
      tpu.vector_store %arg9[%c0_47, %c0_48], %49 {strides = array<i32>} : memref<1x16xf32, #tpu.memory_space<vmem>>, vector<1x16xf32>,
    } else {
    }
    %c1_i32 = arith.constant 1 : i32
    %37 = arith.cmpi eq, %arg0, %c1_i32 : i32
    %38 = arith.extui %37 : i1 to i32
    %c0_i32_38 = arith.constant 0 : i32
    %39 = arith.cmpi ne, %38, %c0_i32_38 : i32
    scf.if %39 {
      %c0_39 = arith.constant 0 : index
      %c0_40 = arith.constant 0 : index
      %40 = vector.load %arg8[%c0_39, %c0_40] : memref<1x16xf32, #tpu.memory_space<vmem>>, vector<1x16xf32>
      %cst_41 = arith.constant 1.280000e+02 : f32
      %41 = vector.broadcast %cst_41 : f32 to vector<1x16xf32>
      %42 = arith.divf %40, %41 : vector<1x16xf32>
      %c0_42 = arith.constant 0 : index
      %c0_43 = arith.constant 0 : index
      %43 = vector.load %arg9[%c0_42, %c0_43] : memref<1x16xf32, #tpu.memory_space<vmem>>, vector<1x16xf32>
      %cst_44 = arith.constant 1.280000e+02 : f32
      %44 = vector.broadcast %cst_44 : f32 to vector<1x16xf32>
      %45 = arith.divf %43, %44 : vector<1x16xf32>
      %46 = arith.mulf %42, %42 : vector<1x16xf32>
      %47 = arith.subf %45, %46 : vector<1x16xf32>
      %48 = vector.broadcast %42 : vector<1x16xf32> to vector<64x16xf32>
      %49 = arith.subf %33, %48 : vector<64x16xf32>
      %cst_45 = arith.constant 9.99999974E-6 : f32
      %50 = vector.broadcast %cst_45 : f32 to vector<1x16xf32>
      %51 = arith.addf %47, %50 : vector<1x16xf32>
      %52 = math.rsqrt %51 : vector<1x16xf32>
      %53 = vector.broadcast %52 : vector<1x16xf32> to vector<64x16xf32>
      %54 = arith.mulf %49, %53 : vector<64x16xf32>
      %c0_46 = arith.constant 0 : index
      %c0_47 = arith.constant 0 : index
      %55 = vector.load %arg4[%c0_46, %c0_47] : memref<1x16xf32, #tpu.memory_space<vmem>>, vector<1x16xf32>
      %56 = vector.broadcast %55 : vector<1x16xf32> to vector<64x16xf32>
      %57 = arith.mulf %54, %56 : vector<64x16xf32>
      %c0_48 = arith.constant 0 : index
      %c0_49 = arith.constant 0 : index
      %58 = vector.load %arg5[%c0_48, %c0_49] : memref<1x16xf32, #tpu.memory_space<vmem>>, vector<1x16xf32>
      %59 = vector.broadcast %58 : vector<1x16xf32> to vector<64x16xf32>
      %60 = arith.addf %57, %59 : vector<64x16xf32>
      %cst_50 = arith.constant 0.000000e+00 : f32
      %61 = vector.broadcast %cst_50 : f32 to vector<64x16xf32>
      %62 = arith.cmpf ogt, %60, %61 : vector<64x16xf32>
      %cst_51 = arith.constant 2.000000e-01 : f32
      %63 = vector.broadcast %cst_51 : f32 to vector<64x16xf32>
      %64 = arith.mulf %63, %60 : vector<64x16xf32>
      %65 = arith.select %62, %60, %64 : vector<64x16xi1>, vector<64x16xf32>
      %c0_52 = arith.constant 0 : index
      %c0_53 = arith.constant 0 : index
      %66 = vector.load %arg6[%c0_52, %c0_53] : memref<64x16xf32, #tpu.memory_space<vmem>>, vector<64x16xf32>
      %67 = arith.mulf %65, %66 : vector<64x16xf32>
      %cst_54 = arith.constant dense<0.000000e+00> : vector<64xf32>
      %68 = vector.multi_reduction <add>, %67, %cst_54 [1] : vector<64x16xf32> to vector<64xf32>
      %69 = vector.shape_cast %68 : vector<64xf32> to vector<64x1xf32>
      %cst_55 = arith.constant dense<0.000000e+00> : vector<1xf32>
      %70 = vector.multi_reduction <add>, %69, %cst_55 [0] : vector<64x1xf32> to vector<1xf32>
      %71 = vector.shape_cast %70 : vector<1xf32> to vector<1x1xf32>
      %72 = arith.negf %71 : vector<1x1xf32>
      %73 = math.exp %72 : vector<1x1xf32>
      %cst_56 = arith.constant 1.000000e+00 : f32
      %74 = vector.broadcast %cst_56 : f32 to vector<1x1xf32>
      %75 = arith.addf %74, %73 : vector<1x1xf32>
      %76 = arith.divf %74, %75 : vector<1x1xf32>
      %77 = arith.index_cast %arg1 : i32 to index
      %c0_57 = arith.constant 0 : index
      %78 = vector.load %arg7[%77, %c0_57] : memref<2x1xf32, #tpu.memory_space<vmem>>, vector<1x1xf32>
      tpu.vector_store %arg7[%77, %c0_57], %76 {strides = array<i32>} : memref<2x1xf32, #tpu.memory_space<vmem>>, vector<1x1xf32>,
    } else {
    }
    return
  }
  func.func @transform_0(%arg0: i32, %arg1: i32) -> (i32, i32, i32, i32) {
    %c0_i32 = arith.constant 0 : i32
    %c0_i32_0 = arith.constant 0 : i32
    %c0_i32_1 = arith.constant 0 : i32
    %c0_i32_2 = arith.constant 0 : i32
    return %arg1, %c0_i32, %c0_i32_0, %c0_i32_1 : i32, i32, i32, i32
  }
  func.func @transform_1(%arg0: i32, %arg1: i32) -> (i32, i32, i32, i32) {
    %c0_i32 = arith.constant 0 : i32
    %c0_i32_0 = arith.constant 0 : i32
    %c0_i32_1 = arith.constant 0 : i32
    %c0_i32_2 = arith.constant 0 : i32
    %c0_i32_3 = arith.constant 0 : i32
    return %c0_i32, %c0_i32_0, %c0_i32_1, %c0_i32_2 : i32, i32, i32, i32
  }
  func.func @transform_2(%arg0: i32, %arg1: i32) -> (i32, i32) {
    %c0_i32 = arith.constant 0 : i32
    %c0_i32_0 = arith.constant 0 : i32
    %c0_i32_1 = arith.constant 0 : i32
    return %c0_i32, %c0_i32_0 : i32, i32
  }
  func.func @transform_3(%arg0: i32, %arg1: i32) -> (i32, i32) {
    %c0_i32 = arith.constant 0 : i32
    %c0_i32_0 = arith.constant 0 : i32
    %c0_i32_1 = arith.constant 0 : i32
    return %c0_i32, %c0_i32_0 : i32, i32
  }
  func.func @transform_4(%arg0: i32, %arg1: i32) -> (i32, i32) {
    %c0_i32 = arith.constant 0 : i32
    %c0_i32_0 = arith.constant 0 : i32
    %c0_i32_1 = arith.constant 0 : i32
    return %c0_i32, %c0_i32_0 : i32, i32
  }
  func.func @transform_5(%arg0: i32, %arg1: i32) -> (i32, i32) {
    %c0_i32 = arith.constant 0 : i32
    %c0_i32_0 = arith.constant 0 : i32
    %c0_i32_1 = arith.constant 0 : i32
    return %c0_i32, %c0_i32_0 : i32, i32
  }
}

</mosaic_0001>

<bundles_post_ra>
// kernel: discriminator_forward.2
= control target key start
LH: loop header
LB: loop body
LE: loop exit
PB: predicated region body
PF: predicated region fallthrough
CT: control target
= control target key end

     0   :  { %s2619_s12 = smov 0   ;;  %s3176_s0 = inlined_call_operand.vmem [shape: f32[2,17,17,16], index: 0, kind: input, shape index: {}]   ;;  %s3177_s1 = inlined_call_operand.vmem [shape: f32[2,2,16,8], index: 1, kind: input, shape index: {}]   ;;  %s3178_s2 = inlined_call_operand.vmem [shape: f32[1,8], index: 2, kind: input, shape index: {}]   ;;  %s3179_s3 = inlined_call_operand.vmem [shape: f32[2,8,256], index: 3, kind: output, shape index: {}]  }
   0x1 LB: > { %s1916_s13 = sadd.s32 4294967295, %s2597_s12   ;;  %p1920_p0 = scmp.ge.s32.totalorder %s2597_s12, 1  ;;  %s2597_s12 = sphi %s2619_s12, %s13_s12  }
   0x2   : > { %p137_p1 = scmp.lt.s32.totalorder %s2597_s12, 3 }
   0x4   : > { %p138_p2 = pnand %p1920_p0, %p137_p1 }
   0x5   : > { %v1924_v0 = vld [vmem:[%s3177_s1 + $0x10] sm:$0xff] (!%p138_p2)  ;;  %v1925_v1 = vld [vmem:[%s3177_s1 + $0x18] sm:$0xff] (!%p138_p2)  ;;  %v2022_v2 = vld [vmem:[%s3177_s1 + $0x20] sm:$0xff] (!%p138_p2)  ;;  %p161_p3 = scmp.lt.s32.totalorder (!%p138_p2), %s1916_s13, 1  ;;  %vm240_vm0 = vcmask (!%p138_p2), 130048  }
   0x6   : > { %141 = sbr.rel (%p138_p2) target bundleno = 465 (0x1d1), region = 32  ;;  %v2470_v3 = vpack.c.bf16 (!%p138_p2), %v1925_v1, %v1924_v0  ;;  %v2023_v4 = vld [vmem:[%s3177_s1 + $0x28] sm:$0xff] (!%p138_p2)  ;;  %v203_v5 = vld [vmem:[%s3177_s1] sm:$0xff] (!%p138_p2)  ;;  %v2088_v9 = vld [vmem:[%s3177_s1 + $0x30] sm:$0xff] (!%p138_p2) }
   0x7   : > { %v204_v6 = vld [vmem:[%s3177_s1 + $0x8] sm:$0xff] (!%p138_p2)  ;;  %v2478_v7 = vpack.c.bf16 (!%p138_p2), %v2023_v4, %v2022_v2  ;;  %v2089_v10 = vld [vmem:[%s3177_s1 + $0x38] sm:$0xff] (!%p138_p2) }
   0x8   : > { %v2474_v8 = vpack.c.bf16 (!%p138_p2), %v204_v6, %v203_v5  ;;  %2471 = vmatprep.subr.bf16.mxu1 (!%p138_p2), %v2470_v3  ;;  %v2482_v11 = vpack.c.bf16 (!%p138_p2), %v2089_v10, %v2088_v9 }
   0x9   : > { %2479 = vmatprep.subr.bf16.mxu0 (!%p138_p2), %v2478_v7  ;;  %2473 = vmatpush3.bf16.msra.mxu1 (!%p138_p2), %v2470_v3 }
   0xa   : > { %2481 = vmatpush3.bf16.msra.mxu0 (!%p138_p2), %v2478_v7  ;;  %2475 = vmatprep.subr.bf16.mxu1 (!%p138_p2), %v2474_v8 }
   0xb   : > { %2483 = vmatprep.subr.bf16.mxu0 (!%p138_p2), %v2482_v11 }
   0xd   : > { %s3181_s13 = smov (!%p161_p3, %s1916_s13), 1 }
   0xe   : > { %s2582_s30 = smul.u32 408, %s3181_s13  ;;  %s2125_s9 = sshll.u32 %s3181_s13, 4 }
   0xf   : > { %s170_s14 = scalar_lea.vmem %s3179_s3, %s2125_s9 }
  0x10   : > { %s2657_s6 = scalar_lea.vmem %s3176_s0, %s2582_s30 }
  0x11   : > { %v205_v12 = vld [vmem:[%s2657_s6 + $0x1] sm:$0xff]  ;;  %v2661_v13 = vld [vmem:[%s2657_s6 + $0x18] sm:$0xff]  ;;  %v206_v14 = vld [vmem:[%s2657_s6 + $0x9] sm:$0xff] }
  0x12   : > { %2266 = vmatprep.mubr.msk.f32.mxu1 %vm240_vm0, %v205_v12  ;;  %2370 = vmatprep.mubr.msk.f32.mxu0 %vm240_vm0, %v2661_v13  ;;  %v2668_v15 = vld [vmem:[%s2657_s6 + $0x20] sm:$0xff]  ;;  %v2674_v17 = vld [vmem:[%s2657_s6 + $0x30] sm:$0xff]  ;;  %v2683_v19 = vld [vmem:[%s2657_s6 + $0x38] sm:$0xff] }
  0x13   : > { %v2671_v16 = vld [vmem:[%s2657_s6 + $0x19] sm:$0xff]  ;;  %2267 = vmatmul.mubr.msk.f32.vlgmr.msra.gmra.mrb[0].mxu1 %vm240_vm0, %v206_v14  ;;  %2371 = vmatmul.mubr.msk.f32.vlgmr.msra.gmra.mrb[0].mxu0 %vm240_vm0, %v2668_v15  ;;  %v2680_v18 = vld [vmem:[%s2657_s6 + $0x21] sm:$0xff]  ;;  %v2690_v20 = vld [vmem:[%s2657_s6 + $0x31] sm:$0xff] }
  0x14   : > { %2477 = vmatpush3.bf16.msra.mxu1 %v2474_v8  ;;  %2485 = vmatpush3.bf16.msra.mxu0 %v2482_v11  ;;  %v2693_v21 = vld [vmem:[%s2657_s6 + $0x48] sm:$0xff]  ;;  %v2704_v22 = vld [vmem:[%s2657_s6 + $0x39] sm:$0xff]  ;;  %v2707_v23 = vld [vmem:[%s2657_s6 + $0x50] sm:$0xff] }
  0x15   : > { %2269 = vmatprep.mubr.msk.f32.mxu1 %vm240_vm0, %v2671_v16  ;;  %2373 = vmatprep.mubr.msk.f32.mxu0 %vm240_vm0, %v2674_v17  ;;  %v2710_v24 = vld [vmem:[%s2657_s6 + $0x49] sm:$0xff]  ;;  %v2713_v25 = vld [vmem:[%s2657_s6 + $0x60] sm:$0xff]  ;;  %v2724_v26 = vld [vmem:[%s2657_s6 + $0x51] sm:$0xff] }
  0x16   : > { %v2727_v27 = vld [vmem:[%s2657_s6 + $0x68] sm:$0xff]  ;;  %v2733_v29 = vld [vmem:[%s2657_s6 + $0x78] sm:$0xff]  ;;  %v2747_v31 = vld [vmem:[%s2657_s6 + $0x80] sm:$0xff] }
  0x17   : > { %2270 = vmatmul.mubr.msk.f32.gmra.mrb[2].mxu1 %vm240_vm0, %v2680_v18  ;;  %2374 = vmatmul.mubr.msk.f32.gmra.mrb[2].mxu0 %vm240_vm0, %v2683_v19  ;;  %v2730_v28 = vld [vmem:[%s2657_s6 + $0x61] sm:$0xff]  ;;  %v2744_v30 = vld [vmem:[%s2657_s6 + $0x69] sm:$0xff]  ;;  %v2750_v32 = vld [vmem:[%s2657_s6 + $0x79] sm:$0xff] }
  0x18   : > { %2272 = vmatprep.mubr.msk.f32.mxu1 %vm240_vm0, %v2690_v20  ;;  %2376 = vmatprep.mubr.msk.f32.mxu0 %vm240_vm0, %v2693_v21  ;;  %v2753_v33 = vld [vmem:[%s2657_s6 + $0x90] sm:$0xff]  ;;  %v2764_v34 = vld [vmem:[%s2657_s6 + $0x81] sm:$0xff]  ;;  %v2767_v35 = vld [vmem:[%s2657_s6 + $0x98] sm:$0xff] }
  0x19   : > { %v2770_v36 = vld [vmem:[%s2657_s6 + $0x91] sm:$0xff]  ;;  %v2773_v37 = vld [vmem:[%s2657_s6 + $0xa8] sm:$0xff]  ;;  %v2784_v38 = vld [vmem:[%s2657_s6 + $0x99] sm:$0xff] }
  0x1a   : > { %v2787_v39 = vld [vmem:[%s2657_s6 + $0xb0] sm:$0xff]  ;;  %v2793_v41 = vld [vmem:[%s2657_s6 + $0xc0] sm:$0xff]  ;;  %v2807_v43 = vld [vmem:[%s2657_s6 + $0xc8] sm:$0xff] }
  0x1b   : > { %2273 = vmatmul.mubr.msk.f32.gmra.mrb[4].mxu1 %vm240_vm0, %v2704_v22  ;;  %2377 = vmatmul.mubr.msk.f32.gmra.mrb[4].mxu0 %vm240_vm0, %v2707_v23  ;;  %v2790_v40 = vld [vmem:[%s2657_s6 + $0xa9] sm:$0xff]  ;;  %v2804_v42 = vld [vmem:[%s2657_s6 + $0xb1] sm:$0xff]  ;;  %v2810_v44 = vld [vmem:[%s2657_s6 + $0xc1] sm:$0xff] }
  0x1c   : > { %2275 = vmatprep.mubr.msk.f32.mxu1 %vm240_vm0, %v2710_v24  ;;  %2379 = vmatprep.mubr.msk.f32.mxu0 %vm240_vm0, %v2713_v25  ;;  %v2813_v45 = vld [vmem:[%s2657_s6 + $0xd8] sm:$0xff]  ;;  %v2824_v46 = vld [vmem:[%s2657_s6 + $0xc9] sm:$0xff]  ;;  %v2827_v47 = vld [vmem:[%s2657_s6 + $0xe0] sm:$0xff] }
  0x1d   : > { %v2830_v48 = vld [vmem:[%s2657_s6 + $0xd9] sm:$0xff]  ;;  %v2833_v49 = vld [vmem:[%s2657_s6 + $0xf0] sm:$0xff]  ;;  %v2844_v50 = vld [vmem:[%s2657_s6 + $0xe1] sm:$0xff] }
  0x1e   : > { %v2847_v51 = vld [vmem:[%s2657_s6 + $0xf8] sm:$0xff]  ;;  %v2853_v53 = vld [vmem:[%s2657_s6 + $0x108] sm:$0xff]  ;;  %v2867_v55 = vld [vmem:[%s2657_s6 + $0x110] sm:$0xff] }
  0x1f   : > { %2276 = vmatmul.mubr.msk.f32.gmra.mrb[6].mxu1 %vm240_vm0, %v2724_v26  ;;  %2380 = vmatmul.mubr.msk.f32.gmra.mrb[6].mxu0 %vm240_vm0, %v2727_v27  ;;  %v2850_v52 = vld [vmem:[%s2657_s6 + $0xf1] sm:$0xff]  ;;  %v2864_v54 = vld [vmem:[%s2657_s6 + $0xf9] sm:$0xff]  ;;  %v2870_v56 = vld [vmem:[%s2657_s6 + $0x109] sm:$0xff] }
  0x20   : > { %2278 = vmatprep.mubr.msk.f32.mxu1 %vm240_vm0, %v2730_v28  ;;  %2382 = vmatprep.mubr.msk.f32.mxu0 %vm240_vm0, %v2733_v29  ;;  %v2873_v57 = vld [vmem:[%s2657_s6 + $0x120] sm:$0xff]  ;;  %v2884_v58 = vld [vmem:[%s2657_s6 + $0x111] sm:$0xff]  ;;  %v2887_v59 = vld [vmem:[%s2657_s6 + $0x128] sm:$0xff] }
  0x21   : > { %v2890_v60 = vld [vmem:[%s2657_s6 + $0x121] sm:$0xff]  ;;  %v2893_v61 = vld [vmem:[%s2657_s6 + $0x138] sm:$0xff]  ;;  %v2904_v62 = vld [vmem:[%s2657_s6 + $0x129] sm:$0xff] }
  0x22   : > { %v2907_v63 = vld [vmem:[%s2657_s6 + $0x140] sm:$0xff]  ;;  %v2913_v1 = vld [vmem:[%s2657_s6 + $0x150] sm:$0xff]  ;;  %v2927_v3 = vld [vmem:[%s2657_s6 + $0x158] sm:$0xff] }
  0x23   : > { %2279 = vmatmul.mubr.msk.f32.gmra.mrb[8].mxu1 %vm240_vm0, %v2744_v30  ;;  %2383 = vmatmul.mubr.msk.f32.gmra.mrb[8].mxu0 %vm240_vm0, %v2747_v31  ;;  %v2910_v0 = vld [vmem:[%s2657_s6 + $0x139] sm:$0xff]  ;;  %v2924_v2 = vld [vmem:[%s2657_s6 + $0x141] sm:$0xff]  ;;  %v2930_v4 = vld [vmem:[%s2657_s6 + $0x151] sm:$0xff] }
  0x24   : > { %2281 = vmatprep.mubr.msk.f32.mxu1 %vm240_vm0, %v2750_v32  ;;  %2385 = vmatprep.mubr.msk.f32.mxu0 %vm240_vm0, %v2753_v33  ;;  %v2933_v5 = vld [vmem:[%s2657_s6 + $0x168] sm:$0xff]  ;;  %v2944_v6 = vld [vmem:[%s2657_s6 + $0x159] sm:$0xff]  ;;  %v2947_v7 = vld [vmem:[%s2657_s6 + $0x170] sm:$0xff] }
  0x25   : > { %v2950_v8 = vld [vmem:[%s2657_s6 + $0x169] sm:$0xff]  ;;  %v2020_v9 = vld [vmem:[%s2657_s6 + $0x180] sm:$0xff]  ;;  %v2961_v10 = vld [vmem:[%s2657_s6 + $0x171] sm:$0xff] }
  0x26   : > { %v2021_v11 = vld [vmem:[%s2657_s6 + $0x188] sm:$0xff]  ;;  %v171_v12 = vld [vmem:[%s2657_s6] sm:$0xff] }
  0x27   : > { %2282 = vmatmul.mubr.msk.f32.gmra.mrb[10].mxu1 %vm240_vm0, %v2764_v34  ;;  %2386 = vmatmul.mubr.msk.f32.gmra.mrb[10].mxu0 %vm240_vm0, %v2767_v35  ;;  %v172_v14 = vld [vmem:[%s2657_s6 + $0x8] sm:$0xff] }
  0x28   : > { %2284 = vmatprep.mubr.msk.f32.mxu1 %vm240_vm0, %v2770_v36  ;;  %2388 = vmatprep.mubr.msk.f32.mxu0 %vm240_vm0, %v2773_v37 }
  0x2b   : > { %2285 = vmatmul.mubr.msk.f32.gmra.mrb[12].mxu1 %vm240_vm0, %v2784_v38  ;;  %2389 = vmatmul.mubr.msk.f32.gmra.mrb[12].mxu0 %vm240_vm0, %v2787_v39 }
  0x2c   : > { %2287 = vmatprep.mubr.msk.f32.mxu1 %vm240_vm0, %v2790_v40  ;;  %2391 = vmatprep.mubr.msk.f32.mxu0 %vm240_vm0, %v2793_v41 }
  0x2f   : > { %2288 = vmatmul.mubr.msk.f32.gmra.mrb[14].mxu1 %vm240_vm0, %v2804_v42  ;;  %2392 = vmatmul.mubr.msk.f32.gmra.mrb[14].mxu0 %vm240_vm0, %v2807_v43 }
  0x30   : > { %2290 = vmatprep.mubr.msk.f32.mxu1 %vm240_vm0, %v2810_v44  ;;  %2394 = vmatprep.mubr.msk.f32.mxu0 %vm240_vm0, %v2813_v45 }
  0x33   : > { %2291 = vmatmul.mubr.msk.f32.gmra.mrb[16].mxu1 %vm240_vm0, %v2824_v46  ;;  %2395 = vmatmul.mubr.msk.f32.gmra.mrb[16].mxu0 %vm240_vm0, %v2827_v47 }
  0x34   : > { %2293 = vmatprep.mubr.msk.f32.mxu1 %vm240_vm0, %v2830_v48  ;;  %2397 = vmatprep.mubr.msk.f32.mxu0 %vm240_vm0, %v2833_v49 }
  0x37   : > { %2294 = vmatmul.mubr.msk.f32.gmra.mrb[18].mxu1 %vm240_vm0, %v2844_v50  ;;  %2398 = vmatmul.mubr.msk.f32.gmra.mrb[18].mxu0 %vm240_vm0, %v2847_v51 }
  0x38   : > { %2296 = vmatprep.mubr.msk.f32.mxu1 %vm240_vm0, %v2850_v52  ;;  %2400 = vmatprep.mubr.msk.f32.mxu0 %vm240_vm0, %v2853_v53 }
  0x3b   : > { %2297 = vmatmul.mubr.msk.f32.gmra.mrb[20].mxu1 %vm240_vm0, %v2864_v54  ;;  %2401 = vmatmul.mubr.msk.f32.gmra.mrb[20].mxu0 %vm240_vm0, %v2867_v55 }
  0x3c   : > { %2299 = vmatprep.mubr.msk.f32.mxu1 %vm240_vm0, %v2870_v56  ;;  %2403 = vmatprep.mubr.msk.f32.mxu0 %vm240_vm0, %v2873_v57 }
  0x3f   : > { %2300 = vmatmul.mubr.msk.f32.gmra.mrb[22].mxu1 %vm240_vm0, %v2884_v58  ;;  %2404 = vmatmul.mubr.msk.f32.gmra.mrb[22].mxu0 %vm240_vm0, %v2887_v59 }
  0x40   : > { %2302 = vmatprep.mubr.msk.f32.mxu1 %vm240_vm0, %v2890_v60  ;;  %2406 = vmatprep.mubr.msk.f32.mxu0 %vm240_vm0, %v2893_v61 }
  0x43   : > { %2303 = vmatmul.mubr.msk.f32.gmra.mrb[24].mxu1 %vm240_vm0, %v2904_v62  ;;  %2407 = vmatmul.mubr.msk.f32.gmra.mrb[24].mxu0 %vm240_vm0, %v2907_v63 }
  0x44   : > { %2305 = vmatprep.mubr.msk.f32.mxu1 %vm240_vm0, %v2910_v0  ;;  %2409 = vmatprep.mubr.msk.f32.mxu0 %vm240_vm0, %v2913_v1 }
  0x47   : > { %2306 = vmatmul.mubr.msk.f32.gmra.mrb[26].mxu1 %vm240_vm0, %v2924_v2  ;;  %2410 = vmatmul.mubr.msk.f32.gmra.mrb[26].mxu0 %vm240_vm0, %v2927_v3 }
  0x48   : > { %2308 = vmatprep.mubr.msk.f32.mxu1 %vm240_vm0, %v2930_v4  ;;  %2412 = vmatprep.mubr.msk.f32.mxu0 %vm240_vm0, %v2933_v5 }
  0x4b   : > { %2309 = vmatmul.mubr.msk.f32.gmra.mrb[28].mxu1 %vm240_vm0, %v2944_v6  ;;  %2413 = vmatmul.mubr.msk.f32.gmra.mrb[28].mxu0 %vm240_vm0, %v2947_v7 }
  0x4c   : > { %2311 = vmatprep.mubr.msk.f32.mxu1 %vm240_vm0, %v2950_v8  ;;  %2415 = vmatprep.mubr.msk.f32.mxu0 %vm240_vm0, %v2020_v9 }
  0x4f   : > { %2312 = vmatmul.mubr.msk.f32.gmra.mrb[30].mxu1 %vm240_vm0, %v2961_v10  ;;  %2416 = vmatmul.mubr.msk.f32.gmra.mrb[30].mxu0 %vm240_vm0, %v2021_v11 }
  0x50   : > { %2318 = vmatprep.mubr.msk.f32.mxu1 %vm240_vm0, %v171_v12  ;;  %2422 = vmatprep.mubr.msk.f32.mxu0 %vm240_vm0, %v2671_v16 }
  0x53   : > { %2319 = vmatmul.mubr.msk.f32.vlgmr.msra.gmra.mrb[0].mxu1 %vm240_vm0, %v172_v14  ;;  %2423 = vmatmul.mubr.msk.f32.vlgmr.msra.gmra.mrb[0].mxu0 %vm240_vm0, %v2680_v18 }
  0x54   : > { %2321 = vmatprep.mubr.msk.f32.mxu1 %vm240_vm0, %v2661_v13  ;;  %2425 = vmatprep.mubr.msk.f32.mxu0 %vm240_vm0, %v2690_v20  ;;  %v2086_v13 = vld [vmem:[%s2657_s6 + $0x181] sm:$0xff] }
  0x57   : > { %2322 = vmatmul.mubr.msk.f32.gmra.mrb[2].mxu1 %vm240_vm0, %v2668_v15  ;;  %2426 = vmatmul.mubr.msk.f32.gmra.mrb[2].mxu0 %vm240_vm0, %v2704_v22  ;;  %v2087_v15 = vld [vmem:[%s2657_s6 + $0x189] sm:$0xff] }
  0x58   : > { %2324 = vmatprep.mubr.msk.f32.mxu1 %vm240_vm0, %v2674_v17  ;;  %2428 = vmatprep.mubr.msk.f32.mxu0 %vm240_vm0, %v2710_v24 }
  0x5b   : > { %2325 = vmatmul.mubr.msk.f32.gmra.mrb[4].mxu1 %vm240_vm0, %v2683_v19  ;;  %2429 = vmatmul.mubr.msk.f32.gmra.mrb[4].mxu0 %vm240_vm0, %v2724_v26  ;;  %v3098_v19 = vld [vmem:[%s3178_s2] ss:$0 sm:$0xff] }
  0x5c   : > { %2327 = vmatprep.mubr.msk.f32.mxu1 %vm240_vm0, %v2693_v21  ;;  %2431 = vmatprep.mubr.msk.f32.mxu0 %vm240_vm0, %v2730_v28 }
  0x5f   : > { %2328 = vmatmul.mubr.msk.f32.gmra.mrb[6].mxu1 %vm240_vm0, %v2707_v23  ;;  %2432 = vmatmul.mubr.msk.f32.gmra.mrb[6].mxu0 %vm240_vm0, %v2744_v30 }
  0x60   : > { %2330 = vmatprep.mubr.msk.f32.mxu1 %vm240_vm0, %v2713_v25  ;;  %2434 = vmatprep.mubr.msk.f32.mxu0 %vm240_vm0, %v2750_v32 }
  0x63   : > { %2331 = vmatmul.mubr.msk.f32.gmra.mrb[8].mxu1 %vm240_vm0, %v2727_v27  ;;  %2435 = vmatmul.mubr.msk.f32.gmra.mrb[8].mxu0 %vm240_vm0, %v2764_v34 }
  0x64   : > { %2333 = vmatprep.mubr.msk.f32.mxu1 %vm240_vm0, %v2733_v29  ;;  %2437 = vmatprep.mubr.msk.f32.mxu0 %vm240_vm0, %v2770_v36 }
  0x67   : > { %2334 = vmatmul.mubr.msk.f32.gmra.mrb[10].mxu1 %vm240_vm0, %v2747_v31  ;;  %2438 = vmatmul.mubr.msk.f32.gmra.mrb[10].mxu0 %vm240_vm0, %v2784_v38 }
  0x68   : > { %2336 = vmatprep.mubr.msk.f32.mxu1 %vm240_vm0, %v2753_v33  ;;  %2440 = vmatprep.mubr.msk.f32.mxu0 %vm240_vm0, %v2790_v40 }
  0x6b   : > { %2337 = vmatmul.mubr.msk.f32.gmra.mrb[12].mxu1 %vm240_vm0, %v2767_v35  ;;  %2441 = vmatmul.mubr.msk.f32.gmra.mrb[12].mxu0 %vm240_vm0, %v2804_v42 }
  0x6c   : > { %2339 = vmatprep.mubr.msk.f32.mxu1 %vm240_vm0, %v2773_v37  ;;  %2443 = vmatprep.mubr.msk.f32.mxu0 %vm240_vm0, %v2810_v44 }
  0x6f   : > { %2340 = vmatmul.mubr.msk.f32.gmra.mrb[14].mxu1 %vm240_vm0, %v2787_v39  ;;  %2444 = vmatmul.mubr.msk.f32.gmra.mrb[14].mxu0 %vm240_vm0, %v2824_v46 }
  0x70   : > { %2342 = vmatprep.mubr.msk.f32.mxu1 %vm240_vm0, %v2793_v41  ;;  %2446 = vmatprep.mubr.msk.f32.mxu0 %vm240_vm0, %v2830_v48 }
  0x73   : > { %2343 = vmatmul.mubr.msk.f32.gmra.mrb[16].mxu1 %vm240_vm0, %v2807_v43  ;;  %2447 = vmatmul.mubr.msk.f32.gmra.mrb[16].mxu0 %vm240_vm0, %v2844_v50 }
  0x74   : > { %2345 = vmatprep.mubr.msk.f32.mxu1 %vm240_vm0, %v2813_v45  ;;  %2449 = vmatprep.mubr.msk.f32.mxu0 %vm240_vm0, %v2850_v52 }
  0x77   : > { %2346 = vmatmul.mubr.msk.f32.gmra.mrb[18].mxu1 %vm240_vm0, %v2827_v47  ;;  %2450 = vmatmul.mubr.msk.f32.gmra.mrb[18].mxu0 %vm240_vm0, %v2864_v54 }
  0x78   : > { %2348 = vmatprep.mubr.msk.f32.mxu1 %vm240_vm0, %v2833_v49  ;;  %2452 = vmatprep.mubr.msk.f32.mxu0 %vm240_vm0, %v2870_v56 }
  0x7b   : > { %2349 = vmatmul.mubr.msk.f32.gmra.mrb[20].mxu1 %vm240_vm0, %v2847_v51  ;;  %2453 = vmatmul.mubr.msk.f32.gmra.mrb[20].mxu0 %vm240_vm0, %v2884_v58 }
  0x7c   : > { %2351 = vmatprep.mubr.msk.f32.mxu1 %vm240_vm0, %v2853_v53  ;;  %2455 = vmatprep.mubr.msk.f32.mxu0 %vm240_vm0, %v2890_v60 }
  0x7f   : > { %2352 = vmatmul.mubr.msk.f32.gmra.mrb[22].mxu1 %vm240_vm0, %v2867_v55  ;;  %2456 = vmatmul.mubr.msk.f32.gmra.mrb[22].mxu0 %vm240_vm0, %v2904_v62 }
  0x80   : > { %2354 = vmatprep.mubr.msk.f32.mxu1 %vm240_vm0, %v2873_v57  ;;  %2458 = vmatprep.mubr.msk.f32.mxu0 %vm240_vm0, %v2910_v0 }
  0x83   : > { %2355 = vmatmul.mubr.msk.f32.gmra.mrb[24].mxu1 %vm240_vm0, %v2887_v59  ;;  %2459 = vmatmul.mubr.msk.f32.gmra.mrb[24].mxu0 %vm240_vm0, %v2924_v2 }
  0x84   : > { %2357 = vmatprep.mubr.msk.f32.mxu1 %vm240_vm0, %v2893_v61  ;;  %2461 = vmatprep.mubr.msk.f32.mxu0 %vm240_vm0, %v2930_v4 }
  0x87   : > { %2358 = vmatmul.mubr.msk.f32.gmra.mrb[26].mxu1 %vm240_vm0, %v2907_v63  ;;  %2462 = vmatmul.mubr.msk.f32.gmra.mrb[26].mxu0 %vm240_vm0, %v2944_v6 }
  0x88   : > { %2360 = vmatprep.mubr.msk.f32.mxu1 %vm240_vm0, %v2913_v1  ;;  %2464 = vmatprep.mubr.msk.f32.mxu0 %vm240_vm0, %v2950_v8 }
  0x8b   : > { %2361 = vmatmul.mubr.msk.f32.gmra.mrb[28].mxu1 %vm240_vm0, %v2927_v3  ;;  %2465 = vmatmul.mubr.msk.f32.gmra.mrb[28].mxu0 %vm240_vm0, %v2961_v10 }
  0x8c   : > { %2363 = vmatprep.mubr.msk.f32.mxu1 %vm240_vm0, %v2933_v5  ;;  %2467 = vmatprep.mubr.msk.f32.mxu0 %vm240_vm0, %v2086_v13 }
  0x8f   : > { %2364 = vmatmul.mubr.msk.f32.gmra.mrb[30].mxu1 %vm240_vm0, %v2947_v7  ;;  %2468 = vmatmul.mubr.msk.f32.gmra.mrb[30].mxu0 %vm240_vm0, %v2087_v15 }
 0x126   : > { %v2320_v16 = vpop.f32.mrb[0].mxu1  ;;  %v2424_v17 = vpop.f32.mrb[0].mxu0 }
 0x127   : > { %v2486_v18 = vadd.f32 %v2424_v17, %v2320_v16  ;;  %v724_v20 = vpop.f32.mrb[1].mxu1  ;;  %v1469_v21 = vpop.f32.mrb[1].mxu0 }
 0x128   : > { %v2487_v22 = vadd.f32 %v1469_v21, %v724_v20 }
 0x129   : > { %v1668_v23 = vadd.f32 %v2486_v18, %v3098_v19 }
 0x12a   : > { %v1667_v24 = vadd.f32 %v2487_v22, %v3098_v19  ;;  %v2323_v25 = vpop.f32.mrb[2].mxu1  ;;  %v2427_v26 = vpop.f32.mrb[2].mxu0 }
 0x12b   : > { %v2488_v27 = vadd.f32 %v2427_v26, %v2323_v25  ;;  %v734_v28 = vpop.f32.mrb[3].mxu1  ;;  %v1479_v29 = vpop.f32.mrb[3].mxu0  ;;  %v1732_v36 = vmul.f32 0.2, %v1668_v23  ;;  %vm1700_vm2 = vcmp.gt.f32.partialorder %v1668_v23, 0.0 }
 0x12c   : > { %v2489_v30 = vadd.f32 %v1479_v29, %v734_v28  ;;  %vm1699_vm1 = vcmp.gt.f32.partialorder %v1667_v24, 0.0  ;;  %v1731_v31 = vmul.f32 0.2, %v1667_v24 }
 0x12d   : > { %v1670_v41 = vadd.f32 %v2488_v27, %v3098_v19  ;;  %v1764_v44 = vsel %vm1700_vm2, %v1668_v23, %v1732_v36 }
 0x12e   : > { %v1669_v32 = vadd.f32 %v2489_v30, %v3098_v19  ;;  %v2326_v33 = vpop.f32.mrb[4].mxu1  ;;  %v2430_v34 = vpop.f32.mrb[4].mxu0  ;;  %v1763_v35 = vsel %vm1699_vm1, %v1667_v24, %v1731_v31 }
 0x12f   : > { %v2490_v37 = vadd.f32 %v2430_v34, %v2326_v33  ;;  %v1489_v38 = vpop.f32.mrb[5].mxu0  ;;  %1795 = vxpose.xlu0.b32.start [1/16] (narrow) %v1763_v35, 8  ;;  %v744_v39 = vpop.f32.mrb[5].mxu1  ;;  %v1734_v54 = vmul.f32 0.2, %v1670_v41  ;;  %vm1702_vm4 = vcmp.gt.f32.partialorder %v1670_v41, 0.0 }
 0x130   : > { %v2491_v40 = vadd.f32 %v1489_v38, %v744_v39  ;;  %v1733_v45 = vmul.f32 0.2, %v1669_v32  ;;  %vm1701_vm3 = vcmp.gt.f32.partialorder %v1669_v32, 0.0 }
 0x131   : > { %v1672_v59 = vadd.f32 %v2490_v37, %v3098_v19  ;;  %v1766_v62 = vsel %vm1702_vm4, %v1670_v41, %v1734_v54 }
 0x132   : > { %v2329_v42 = vpop.f32.mrb[6].mxu1  ;;  %v2433_v43 = vpop.f32.mrb[6].mxu0  ;;  %v1671_v50 = vadd.f32 %v2491_v40, %v3098_v19  ;;  %v1765_v53 = vsel %vm1701_vm3, %v1669_v32, %v1733_v45 }
 0x133   : > { %v2492_v46 = vadd.f32 %v2433_v43, %v2329_v42  ;;  %v1499_v47 = vpop.f32.mrb[7].mxu0  ;;  %1796 = vxpose.xlu0.b32.cont [2/16] (narrow) %v1764_v44, 8  ;;  %v754_v48 = vpop.f32.mrb[7].mxu1  ;;  %v1736_v8 = vmul.f32 0.2, %v1672_v59  ;;  %vm1704_vm6 = vcmp.gt.f32.partialorder %v1672_v59, 0.0 }
 0x134   : > { %v2493_v49 = vadd.f32 %v1499_v47, %v754_v48  ;;  %v1735_v63 = vmul.f32 0.2, %v1671_v50  ;;  %vm1703_vm5 = vcmp.gt.f32.partialorder %v1671_v50, 0.0 }
 0x135   : > { %v1674_v14 = vadd.f32 %v2492_v46, %v3098_v19  ;;  %v1768_v16 = vsel %vm1704_vm6, %v1672_v59, %v1736_v8 }
 0x136   : > { %v2332_v51 = vpop.f32.mrb[8].mxu1  ;;  %v2436_v52 = vpop.f32.mrb[8].mxu0  ;;  %v1673_v4 = vadd.f32 %v2493_v49, %v3098_v19  ;;  %v1767_v7 = vsel %vm1703_vm5, %v1671_v50, %v1735_v63 }
 0x137   : > { %v2494_v55 = vadd.f32 %v2436_v52, %v2332_v51  ;;  %v1509_v56 = vpop.f32.mrb[9].mxu0  ;;  %1797 = vxpose.xlu0.b32.cont [3/16] (narrow) %v1765_v53, 8  ;;  %v764_v57 = vpop.f32.mrb[9].mxu1  ;;  %v1738_v27 = vmul.f32 0.2, %v1674_v14  ;;  %vm1706_vm8 = vcmp.gt.f32.partialorder %v1674_v14, 0.0 }
 0x138   : > { %v2495_v58 = vadd.f32 %v1509_v56, %v764_v57  ;;  %v1737_v17 = vmul.f32 0.2, %v1673_v4  ;;  %vm1705_vm7 = vcmp.gt.f32.partialorder %v1673_v4, 0.0 }
 0x139   : > { %v1676_v32 = vadd.f32 %v2494_v55, %v3098_v19  ;;  %v1770_v37 = vsel %vm1706_vm8, %v1674_v14, %v1738_v27 }
 0x13a   : > { %v2335_v60 = vpop.f32.mrb[10].mxu1  ;;  %v2439_v61 = vpop.f32.mrb[10].mxu0  ;;  %v1675_v23 = vadd.f32 %v2495_v58, %v3098_v19  ;;  %v1769_v26 = vsel %vm1705_vm7, %v1673_v4, %v1737_v17 }
 0x13b   : > { %v3106_v0 = vadd.f32 %v2439_v61, %v2335_v60  ;;  %v1519_v1 = vpop.f32.mrb[11].mxu0  ;;  %1798 = vxpose.xlu0.b32.cont [4/16] (narrow) %v1766_v62, 8  ;;  %v774_v2 = vpop.f32.mrb[11].mxu1  ;;  %vm1708_vm11 = vcmp.gt.f32.partialorder %v1676_v32, 0.0  ;;  %v1740_v45 = vmul.f32 0.2, %v1676_v32 }
 0x13c   : > { %v2497_v3 = vadd.f32 %v1519_v1, %v774_v2  ;;  %v1739_v38 = vmul.f32 0.2, %v1675_v23  ;;  %vm1707_vm9 = vcmp.gt.f32.partialorder %v1675_v23, 0.0 }
 0x13d   : > { %v1678_v56 = vadd.f32 %v3106_v0, %v3098_v19  ;;  %v1772_v57 = vsel %vm1708_vm11, %v1676_v32, %v1740_v45 }
 0x13e   : > { %v2338_v5 = vpop.f32.mrb[12].mxu1  ;;  %v2442_v6 = vpop.f32.mrb[12].mxu0  ;;  %v1677_v44 = vadd.f32 %v2497_v3, %v3098_v19  ;;  %v1771_v49 = vsel %vm1707_vm9, %v1675_v23, %v1739_v38 }
 0x13f   : > { %v3109_v9 = vadd.f32 %v2442_v6, %v2338_v5  ;;  %v1529_v10 = vpop.f32.mrb[13].mxu0  ;;  %1799 = vxpose.xlu0.b32.cont [5/16] (narrow) %v1767_v7, 8  ;;  %v784_v11 = vpop.f32.mrb[13].mxu1  ;;  %vm1710_vm15 = vcmp.gt.f32.partialorder %v1678_v56, 0.0  ;;  %v1742_v5 = vmul.f32 0.2, %v1678_v56 }
 0x140   : > { %v3111_v12 = vadd.f32 %v1529_v10, %v784_v11  ;;  %v1741_v62 = vmul.f32 0.2, %v1677_v44  ;;  %vm1709_vm13 = vcmp.gt.f32.partialorder %v1677_v44, 0.0 }
 0x141   : > { %v1680_v17 = vadd.f32 %v3109_v9, %v3098_v19 }
 0x142   : > { %v2341_v13 = vpop.f32.mrb[14].mxu1  ;;  %v2445_v15 = vpop.f32.mrb[14].mxu0  ;;  %v1679_v0 = vadd.f32 %v3111_v12, %v3098_v19  ;;  %v1773_v10 = vsel %vm1709_vm13, %v1677_v44, %v1741_v62 }
 0x143   : > { %v3114_v18 = vadd.f32 %v2445_v15, %v2341_v13  ;;  %v1539_v20 = vpop.f32.mrb[15].mxu0  ;;  %1800 = vxpose.xlu0.b32.cont [6/16] (narrow) %v1768_v16, 8  ;;  %v794_v21 = vpop.f32.mrb[15].mxu1  ;;  %vm1712_vm3 = vcmp.gt.f32.partialorder %v1680_v17, 0.0 }
 0x144   : > { %v3116_v22 = vadd.f32 %v1539_v20, %v794_v21  ;;  %v1774_v21 = vsel %vm1710_vm15, %v1678_v56, %v1742_v5  ;;  %vm1711_vm1 = vcmp.gt.f32.partialorder %v1679_v0, 0.0  ;;  %v1743_v23 = vmul.f32 0.2, %v1679_v0 }
 0x146   : > { %v2344_v24 = vpop.f32.mrb[16].mxu1  ;;  %v2448_v25 = vpop.f32.mrb[16].mxu0 }
 0x147   : > { %v2502_v28 = vadd.f32 %v2448_v25, %v2344_v24  ;;  %v1549_v29 = vpop.f32.mrb[17].mxu0  ;;  %1801 = vxpose.xlu0.b32.cont [7/16] (narrow) %v1769_v26, 8  ;;  %v804_v30 = vpop.f32.mrb[17].mxu1 }
 0x148   : > { %v2503_v31 = vadd.f32 %v1549_v29, %v804_v30 }
 0x149   : > { %v1684_v33 = vadd.f32 %v2502_v28, %v3098_v19 }
 0x14a   : > { %v1683_v34 = vadd.f32 %v2503_v31, %v3098_v19  ;;  %v2347_v35 = vpop.f32.mrb[18].mxu1  ;;  %v2451_v36 = vpop.f32.mrb[18].mxu0 }
 0x14b   : > { %v2504_v39 = vadd.f32 %v2451_v36, %v2347_v35  ;;  %v1559_v40 = vpop.f32.mrb[19].mxu0  ;;  %1802 = vxpose.xlu0.b32.cont [8/16] (narrow) %v1770_v37, 8  ;;  %v814_v41 = vpop.f32.mrb[19].mxu1  ;;  %v1748_v51 = vmul.f32 0.2, %v1684_v33  ;;  %vm1716_vm12 = vcmp.gt.f32.partialorder %v1684_v33, 0.0  ;;  %v1775_v35 = vsel %vm1711_vm1, %v1679_v0, %v1743_v23 }
 0x14c   : > { %v2505_v42 = vadd.f32 %v1559_v40, %v814_v41  ;;  %vm1715_vm10 = vcmp.gt.f32.partialorder %v1683_v34, 0.0  ;;  %v1747_v43 = vmul.f32 0.2, %v1683_v34  ;;  %v1744_v36 = vmul.f32 0.2, %v1680_v17 }
 0x14d   : > { %v1686_v58 = vadd.f32 %v2504_v39, %v3098_v19  ;;  %v1780_v61 = vsel %vm1716_vm12, %v1684_v33, %v1748_v51  ;;  %v1681_v33 = vadd.f32 %v3116_v22, %v3098_v19 }
 0x14e   : > { %v1685_v46 = vadd.f32 %v2505_v42, %v3098_v19  ;;  %v2350_v47 = vpop.f32.mrb[20].mxu1  ;;  %v2454_v48 = vpop.f32.mrb[20].mxu0  ;;  %v1779_v50 = vsel %vm1715_vm10, %v1683_v34, %v1747_v43 }
 0x14f   : > { %v2506_v52 = vadd.f32 %v2454_v48, %v2350_v47  ;;  %v1569_v53 = vpop.f32.mrb[21].mxu0  ;;  %1803 = vxpose.xlu0.b32.cont [9/16] (narrow) %v1771_v49, 8  ;;  %1827 = vxpose.xlu1.b32.start [1/16] (narrow) %v1779_v50, 8  ;;  %v824_v54 = vpop.f32.mrb[21].mxu1  ;;  %v1750_v14 = vmul.f32 0.2, %v1686_v58  ;;  %v1776_v48 = vsel %vm1712_vm3, %v1680_v17, %v1744_v36 }
 0x150   : > { %v2507_v55 = vadd.f32 %v1569_v53, %v824_v54  ;;  %v1749_v63 = vmul.f32 0.2, %v1685_v46  ;;  %vm1717_vm14 = vcmp.gt.f32.partialorder %v1685_v46, 0.0  ;;  %vm1718_vm0 = vcmp.gt.f32.partialorder %v1686_v58, 0.0 }
 0x151   : > { %v1688_v24 = vadd.f32 %v2506_v52, %v3098_v19  ;;  %v1782_v28 = vsel %vm1718_vm0, %v1686_v58, %v1750_v14  ;;  %v1745_v49 = vmul.f32 0.2, %v1681_v33  ;;  %vm1713_vm5 = vcmp.gt.f32.partialorder %v1681_v33, 0.0 }
 0x152   : > { %v2353_v59 = vpop.f32.mrb[22].mxu1  ;;  %v2457_v60 = vpop.f32.mrb[22].mxu0  ;;  %v1687_v6 = vadd.f32 %v2507_v55, %v3098_v19  ;;  %v1781_v11 = vsel %vm1717_vm14, %v1685_v46, %v1749_v63  ;;  %v1682_v46 = vadd.f32 %v3114_v18, %v3098_v19 }
 0x153   : > { %v3128_v1 = vadd.f32 %v2457_v60, %v2353_v59  ;;  %v1579_v2 = vpop.f32.mrb[23].mxu0  ;;  %1804 = vxpose.xlu0.b32.cont [10/16] (narrow) %v1772_v57, 8  ;;  %1828 = vxpose.xlu1.b32.cont [2/16] (narrow) %v1780_v61, 8  ;;  %v834_v3 = vpop.f32.mrb[23].mxu1  ;;  %v1752_v42 = vmul.f32 0.2, %v1688_v24  ;;  %v1777_v62 = vsel %vm1713_vm5, %v1681_v33, %v1745_v49 }
 0x154   : > { %v2509_v4 = vadd.f32 %v1579_v2, %v834_v3  ;;  %v1751_v29 = vmul.f32 0.2, %v1687_v6  ;;  %vm1719_vm2 = vcmp.gt.f32.partialorder %v1687_v6, 0.0  ;;  %vm1720_vm4 = vcmp.gt.f32.partialorder %v1688_v24, 0.0 }
 0x155   : > { %v1690_v50 = vadd.f32 %v3128_v1, %v3098_v19  ;;  %v1784_v54 = vsel %vm1720_vm4, %v1688_v24, %v1752_v42  ;;  %v1746_v60 = vmul.f32 0.2, %v1682_v46  ;;  %vm1714_vm7 = vcmp.gt.f32.partialorder %v1682_v46, 0.0 }
 0x156   : > { %v2356_v7 = vpop.f32.mrb[24].mxu1  ;;  %v2460_v8 = vpop.f32.mrb[24].mxu0  ;;  %v1689_v37 = vadd.f32 %v2509_v4, %v3098_v19  ;;  %v1783_v41 = vsel %vm1719_vm2, %v1687_v6, %v1751_v29 }
 0x157   : > { %v2510_v13 = vadd.f32 %v2460_v8, %v2356_v7  ;;  %v1589_v15 = vpop.f32.mrb[25].mxu0  ;;  %1805 = vxpose.xlu0.b32.cont [11/16] (narrow) %v1773_v10, 8  ;;  %1829 = vxpose.xlu1.b32.cont [3/16] (narrow) %v1781_v11, 8  ;;  %v844_v16 = vpop.f32.mrb[25].mxu1  ;;  %v1754_v1 = vmul.f32 0.2, %v1690_v50  ;;  %v1778_v2 = vsel %vm1714_vm7, %v1682_v46, %v1746_v60 }
 0x158   : > { %v2511_v20 = vadd.f32 %v1589_v15, %v844_v16  ;;  %v1753_v55 = vmul.f32 0.2, %v1689_v37  ;;  %vm1721_vm6 = vcmp.gt.f32.partialorder %v1689_v37, 0.0  ;;  %vm1722_vm8 = vcmp.gt.f32.partialorder %v1690_v50, 0.0 }
 0x159   : > { %v3136_v12 = vadd.f32 %v2510_v13, %v3098_v19  ;;  %v1786_v3 = vsel %vm1722_vm8, %v1690_v50, %v1754_v1 }
 0x15a   : > { %v3141_v25 = vadd.f32 %v2511_v20, %v3098_v19  ;;  %v2359_v26 = vpop.f32.mrb[26].mxu1  ;;  %v2463_v27 = vpop.f32.mrb[26].mxu0  ;;  %v1785_v63 = vsel %vm1721_vm6, %v1689_v37, %v1753_v55 }
 0x15b   : > { %v2512_v30 = vadd.f32 %v2463_v27, %v2359_v26  ;;  %v1599_v31 = vpop.f32.mrb[27].mxu0  ;;  %1806 = vxpose.xlu0.b32.cont [12/16] (narrow) %v1774_v21, 8  ;;  %1830 = vxpose.xlu1.b32.cont [4/16] (narrow) %v1782_v28, 8  ;;  %v854_v9 = vpop.f32.mrb[27].mxu1  ;;  %v1756_v5 = vmul.f32 0.2, %v3136_v12 }
 0x15c   : > { %v2513_v32 = vadd.f32 %v1599_v31, %v854_v9  ;;  %v1755_v4 = vmul.f32 0.2, %v3141_v25  ;;  %vm1723_vm9 = vcmp.gt.f32.partialorder %v3141_v25, 0.0  ;;  %vm1724_vm10 = vcmp.gt.f32.partialorder %v3136_v12, 0.0 }
 0x15d   : > { %v3146_v34 = vadd.f32 %v2512_v30, %v3098_v19 }
 0x15e   : > { %v1693_v38 = vadd.f32 %v2513_v32, %v3098_v19  ;;  %v2362_v39 = vpop.f32.mrb[28].mxu1  ;;  %v2466_v40 = vpop.f32.mrb[28].mxu0  ;;  %v1787_v0 = vsel %vm1723_vm9, %v3141_v25, %v1755_v4 }
 0x15f   : > { %v2514_v43 = vadd.f32 %v2466_v40, %v2362_v39  ;;  %v1609_v44 = vpop.f32.mrb[29].mxu0  ;;  %1807 = vxpose.xlu0.b32.cont [13/16] (narrow) %v1775_v35, 8  ;;  %1831 = vxpose.xlu1.b32.cont [5/16] (narrow) %v1783_v41, 8  ;;  %v864_v45 = vpop.f32.mrb[29].mxu1  ;;  %v1758_v8 = vmul.f32 0.2, %v3146_v34 }
 0x160   : > { %v2515_v22 = vadd.f32 %v1609_v44, %v864_v45  ;;  %v1757_v6 = vmul.f32 0.2, %v1693_v38  ;;  %vm1725_vm11 = vcmp.gt.f32.partialorder %v1693_v38, 0.0  ;;  %vm1726_vm12 = vcmp.gt.f32.partialorder %v3146_v34, 0.0 }
 0x161   : > { %v1696_v47 = vadd.f32 %v2514_v43, %v3098_v19  ;;  %v1790_v10 = vsel %vm1726_vm12, %v3146_v34, %v1758_v8 }
 0x162   : > { %v1695_v51 = vadd.f32 %v2515_v22, %v3098_v19  ;;  %v2365_v52 = vpop.f32.mrb[30].mxu1  ;;  %v2469_v53 = vpop.f32.mrb[30].mxu0  ;;  %v1789_v7 = vsel %vm1725_vm11, %v1693_v38, %v1757_v6 }
 0x163   : > { %v2516_v56 = vadd.f32 %v2469_v53, %v2365_v52  ;;  %v1619_v57 = vpop.f32.mrb[31].mxu0  ;;  %1808 = vxpose.xlu0.b32.cont [14/16] (narrow) %v1776_v48, 8  ;;  %1832 = vxpose.xlu1.b32.cont [6/16] (narrow) %v1784_v54, 8  ;;  %v874_v58 = vpop.f32.mrb[31].mxu1  ;;  %v1760_v13 = vmul.f32 0.2, %v1696_v47 }
 0x164   : > { %v2517_v18 = vadd.f32 %v1619_v57, %v874_v58  ;;  %v1759_v11 = vmul.f32 0.2, %v1695_v51  ;;  %vm1727_vm13 = vcmp.gt.f32.partialorder %v1695_v51, 0.0  ;;  %vm1728_vm14 = vcmp.gt.f32.partialorder %v1696_v47, 0.0 }
 0x165   : > { %v1698_v59 = vadd.f32 %v2516_v56, %v3098_v19  ;;  %v1792_v15 = vsel %vm1728_vm14, %v1696_v47, %v1760_v13 }
 0x166   : > { %v1697_v61 = vadd.f32 %v2517_v18, %v3098_v19  ;;  %v1788_v19 = vsel %vm1724_vm10, %v3136_v12, %v1756_v5  ;;  %v1791_v14 = vsel %vm1727_vm13, %v1695_v51, %v1759_v11 }
 0x167   : > { %1809 = vxpose.xlu0.b32.cont [15/16] (narrow) %v1777_v62, 8  ;;  %1833 = vxpose.xlu1.b32.cont [7/16] (narrow) %v1785_v63, 8  ;;  %v1762_v20 = vmul.f32 0.2, %v1698_v59  ;;  %vm1730_vm0 = vcmp.gt.f32.partialorder %v1698_v59, 0.0 }
 0x168   : > { %v1761_v16 = vmul.f32 0.2, %v1697_v61  ;;  %vm1729_vm15 = vcmp.gt.f32.partialorder %v1697_v61, 0.0 }
 0x169   : > { %v1794_v12 = vsel %vm1730_vm0, %v1698_v59, %v1762_v20 }
 0x16a   : > { %v1793_v17 = vsel %vm1729_vm15, %v1697_v61, %v1761_v16 }
 0x16b   : > { %1810 = vxpose.xlu0.b32.end [16/16] (narrow) %v1778_v2, 8  ;;  %1834 = vxpose.xlu1.b32.cont [8/16] (narrow) %v1786_v3, 8 }
 0x16f   : > { %1835 = vxpose.xlu1.b32.cont [9/16] (narrow) %v1787_v0, 8 }
 0x173   : > { %1836 = vxpose.xlu1.b32.cont [10/16] (narrow) %v1788_v19, 8 }
 0x177   : > { %1837 = vxpose.xlu1.b32.cont [11/16] (narrow) %v1789_v7, 8 }
 0x17b   : > { %1838 = vxpose.xlu1.b32.cont [12/16] (narrow) %v1790_v10, 8 }
 0x17f   : > { %1839 = vxpose.xlu1.b32.cont [13/16] (narrow) %v1791_v14, 8 }
 0x183   : > { %1840 = vxpose.xlu1.b32.cont [14/16] (narrow) %v1792_v15, 8 }
 0x187   : > { %1841 = vxpose.xlu1.b32.cont [15/16] (narrow) %v1793_v17, 8 }
 0x18b   : > { %1842 = vxpose.xlu1.b32.end [16/16] (narrow) %v1794_v12, 8 }
 0x1af   : > { %v1811_v21 = vpop.trf.xlu0 }
 0x1b0   : > { %1859 = vst [vmem:[%s170_s14] sm:$0xff] %v1811_v21 }
 0x1cf   : > { %v1843_v23 = vpop.trf.xlu1 }
 0x1d0   : > { %1860 = vst [vmem:[%s170_s14 + $0x8] sm:$0xff] %v1843_v23 }
 0x1d1 PF: > { %s13_s12 = sadd.s32 1, %s2597_s12  }
 0x1d2   : > { %p10_p4 = scmp.ge.s32.totalorder %s13_s12, 4  }
 0x1d4   :  { %12 = sbr.rel (!%p10_p4) target bundleno = 1 (0x1), region = 66 }

// kernel: discriminator_forward.3
= control target key start
LH: loop header
LB: loop body
LE: loop exit
PB: predicated region body
PF: predicated region fallthrough
CT: control target
= control target key end

     0   :  { %s1450_s18 = smov 0   ;;  %s1452_s19 = smov 0   ;;  %s1714_s0 = inlined_call_operand.vmem [shape: f32[2,9,9,32], index: 0, kind: input, shape index: {}]   ;;  %s1715_s1 = inlined_call_operand.vmem [shape: f32[2,2,32,16], index: 1, kind: input, shape index: {}]   ;;  %s1716_s2 = inlined_call_operand.vmem [shape: f32[1,16], index: 2, kind: input, shape index: {}]   ;;  %s1717_s3 = inlined_call_operand.vmem [shape: f32[1,16], index: 3, kind: input, shape index: {}]   ;;  %s1718_s4 = inlined_call_operand.vmem [shape: f32[64,16], index: 4, kind: input, shape index: {}]   ;;  %s1719_s5 = inlined_call_operand.vmem [shape: f32[2,1], index: 5, kind: output, shape index: {}]  }
   0x1   :  { %s1454_s20 = smov 0   ;;  %s1456_s21 = smov 0  }
   0x2   :  { %s1458_s22 = smov 0  }
   0x3 LB: > { %s24_s23 = sadd.s32 1, %s1409_s20  ;;  %s27_s24 = sadd.s32 1, %s1413_s21  ;;  %s1417_s22 = sphi %s1458_s22, %s15_s22   ;;  %s1413_s21 = sphi %s1456_s21, %s1723_s21   ;;  %s1409_s20 = sphi %s1454_s20, %s1722_s20   ;;  %s1405_s19 = sphi %s1452_s19, %s1721_s19   ;;  %s1401_s18 = sphi %s1450_s18, %s1720_s18  }
   0x4   : > { %p25_p0 = scmp.ge.s32.totalorder %s24_s23, 2  ;;  %p1078_p1 = scmp.ge.s32.totalorder %s1417_s22, 1 }
   0x5   : > { %p194_p2 = scmp.lt.s32.totalorder %s1417_s22, 5 }
   0x6   : > { %s1725_s23 = smov (%p25_p0, %s24_s23), 0  ;;  %s1727_s24 = smov (!%p25_p0, %s27_s24), %s1413_s21 }
   0x7   : > { %p195_p3 = pnand %p1078_p1, %p194_p2  ;;  %p29_p4 = scmp.ge.s32.totalorder %s1727_s24, 2 }
   0x8   : > { %p217_p5 = scmp.lt.s32.totalorder (!%p195_p3), %s1401_s18, 1  ;;  %p222_p6 = scmp.eq.s32.totalorder (!%p195_p3), %s1405_s19, 0 }
   0x9   : > { %s1729_s24 = smov (%p29_p4, %s1727_s24), 0  ;;  %198 = sbr.rel (%p195_p3) target bundleno = 538 (0x21a), region = 40 }
   0xa   : > { %p223_p7 = scmp.eq.s32.totalorder (!%p195_p3), %s1401_s18, 0 }
   0xc   : > { %p224_p8 = pnand (!%p195_p3), %p223_p7, %p222_p6 }
  0x10   : > { %s218_s25 = scalar_select %p217_p5, %s1401_s18, 1 }
  0x11   : > { %227 = sbr.rel (%p224_p8) target bundleno = 24 (0x18), region = 44  ;;  %vm228_vm0 = vcmask (!%p224_p8), 122880   ;;  %v1419_v0 = vmov (!%p224_p8), 0.0  }
  0x12   : > { %s1331_s26 = smul.u32 144, %s218_s25  ;;  %229 = vst.msk [vmem:[#allocation2] sm:$0x1] (!%p224_p8), %vm228_vm0, %v1419_v0  ;;  %230 = vst.msk [vmem:[#allocation3] sm:$0x1] (!%p224_p8), %vm228_vm0, %v1419_v0 }
  0x14   : > { %s1491_s29 = scalar_lea.vmem %s1714_s0, %s1331_s26 }
  0x18 PF: > { %v1080_v1 = vld [vmem:[%s1715_s1 + $0x20] sm:$0xff]  ;;  %v1081_v2 = vld [vmem:[%s1715_s1 + $0x28] sm:$0xff]  ;;  %vm256_vm1 = vcmask 261120   ;;  %v1082_v6 = vld [vmem:[%s1715_s1 + $0x30] sm:$0xff]  ;;  %p1140_p9 = scmp.ne.s32.totalorder %s1405_s19, 0 }
  0x19   : > { %v1108_v3 = vld [vmem:[%s1715_s1 + $0x40] sm:$0xff]  ;;  %v1275_v4 = vpack.c.bf16 %v1081_v2, %v1080_v1  ;;  %v1109_v5 = vld [vmem:[%s1715_s1 + $0x48] sm:$0xff]  ;;  %v1083_v7 = vld [vmem:[%s1715_s1 + $0x38] sm:$0xff]  ;;  %vm820_vm2 = vcmask (!%p1140_p9), 130048   ;;  %vm843_vm3 = vcmask (!%p1140_p9), 122880  }
  0x1a   : > { %v1291_v8 = vpack.c.bf16 %v1109_v5, %v1108_v3  ;;  %v1279_v9 = vpack.c.bf16 %v1083_v7, %v1082_v6  ;;  %v1110_v10 = vld [vmem:[%s1715_s1 + $0x50] sm:$0xff]  ;;  %v1111_v11 = vld [vmem:[%s1715_s1 + $0x58] sm:$0xff]  ;;  %v243_v12 = vld [vmem:[%s1491_s29 + $0x1] sm:$0xff] }
  0x1b   : > { %1276 = vmatprep.subr.bf16.mxu1 %v1275_v4  ;;  %v1295_v13 = vpack.c.bf16 %v1111_v11, %v1110_v10  ;;  %1203 = vmatprep.mubr.msk.f32.mxu1 %vm256_vm1, %v243_v12  ;;  %v1100_v14 = vld [vmem:[%s1491_s29 + $0x10] sm:$0xff]  ;;  %v239_v15 = vld [vmem:[%s1715_s1] sm:$0xff]  ;;  %v240_v16 = vld [vmem:[%s1715_s1 + $0x8] sm:$0xff] }
  0x1c   : > { %1292 = vmatprep.subr.bf16.mxu0 %v1291_v8  ;;  %1278 = vmatpush3.bf16.msra.mxu1 %v1275_v4  ;;  %v1128_v17 = vld [vmem:[%s1715_s1 + $0x60] sm:$0xff]  ;;  %v1283_v18 = vpack.c.bf16 %v240_v16, %v239_v15  ;;  %v1129_v19 = vld [vmem:[%s1715_s1 + $0x68] sm:$0xff]  ;;  %v241_v21 = vld [vmem:[%s1715_s1 + $0x10] sm:$0xff] }
  0x1d   : > { %1294 = vmatpush3.bf16.msra.mxu0 %v1291_v8  ;;  %1280 = vmatprep.subr.bf16.mxu1 %v1279_v9  ;;  %v1299_v20 = vpack.c.bf16 %v1129_v19, %v1128_v17  ;;  %v244_v22 = vld [vmem:[%s1491_s29 + $0x11] sm:$0xff]  ;;  %v1101_v25 = vld [vmem:[%s1491_s29 + $0x20] sm:$0xff] }
  0x1e   : > { %1296 = vmatprep.subr.bf16.mxu0 %v1295_v13  ;;  %1243 = vmatprep.mubr.msk.f32.mxu0 %vm256_vm1, %v1100_v14  ;;  %v242_v23 = vld [vmem:[%s1715_s1 + $0x18] sm:$0xff]  ;;  %v1130_v24 = vld [vmem:[%s1715_s1 + $0x70] sm:$0xff]  ;;  %v245_v27 = vld [vmem:[%s1491_s29 + $0x21] sm:$0xff] }
  0x1f   : > { %v1131_v26 = vld [vmem:[%s1715_s1 + $0x78] sm:$0xff]  ;;  %v1287_v28 = vpack.c.bf16 %v242_v23, %v241_v21  ;;  %v1102_v29 = vld [vmem:[%s1491_s29 + $0x30] sm:$0xff]  ;;  %v1103_v32 = vld [vmem:[%s1491_s29 + $0x40] sm:$0xff] }
  0x20   : > { %1282 = vmatpush3.bf16.msra.mxu1 %v1279_v9  ;;  %v1303_v30 = vpack.c.bf16 %v1131_v26, %v1130_v24  ;;  %v246_v31 = vld [vmem:[%s1491_s29 + $0x31] sm:$0xff]  ;;  %v247_v33 = vld [vmem:[%s1491_s29 + $0x41] sm:$0xff] }
  0x21   : > { %1298 = vmatpush3.bf16.msra.mxu0 %v1295_v13  ;;  %1284 = vmatprep.subr.bf16.mxu1 %v1283_v18  ;;  %v1104_v34 = vld [vmem:[%s1491_s29 + $0x50] sm:$0xff]  ;;  %v1105_v36 = vld [vmem:[%s1491_s29 + $0x60] sm:$0xff] }
  0x22   : > { %1300 = vmatprep.subr.bf16.mxu0 %v1299_v20  ;;  %v248_v35 = vld [vmem:[%s1491_s29 + $0x51] sm:$0xff]  ;;  %v249_v37 = vld [vmem:[%s1491_s29 + $0x61] sm:$0xff] }
  0x23   : > { %1204 = vmatmul.mubr.msk.f32.vlgmr.msra.gmra.mrb[0].mxu1 %vm256_vm1, %v244_v22  ;;  %v1106_v38 = vld [vmem:[%s1491_s29 + $0x70] sm:$0xff]  ;;  %v1107_v40 = vld [vmem:[%s1491_s29 + $0x80] sm:$0xff] }
  0x24   : > { %1244 = vmatmul.mubr.msk.f32.vlgmr.msra.gmra.mrb[0].mxu0 %vm256_vm1, %v1101_v25  ;;  %1286 = vmatpush3.bf16.msra.mxu1 %v1283_v18  ;;  %v250_v39 = vld [vmem:[%s1491_s29 + $0x71] sm:$0xff]  ;;  %v231_v41 = vld [vmem:[%s1491_s29] sm:$0xff] }
  0x25   : > { %1302 = vmatpush3.bf16.msra.mxu0 %v1299_v20  ;;  %1206 = vmatprep.mubr.msk.f32.mxu1 %vm256_vm1, %v245_v27  ;;  %v1127_v42 = vld [vmem:[%s1491_s29 + $0x81] sm:$0xff] }
  0x26   : > { %1246 = vmatprep.mubr.msk.f32.mxu0 %vm256_vm1, %v1102_v29  ;;  %1288 = vmatprep.subr.bf16.mxu1 %v1287_v28 }
  0x27   : > { %1207 = vmatmul.mubr.msk.f32.gmra.mrb[2].mxu1 %vm256_vm1, %v246_v31  ;;  %1304 = vmatprep.subr.bf16.mxu0 %v1303_v30 }
  0x28   : > { %1247 = vmatmul.mubr.msk.f32.gmra.mrb[2].mxu0 %vm256_vm1, %v1103_v32  ;;  %1209 = vmatprep.mubr.msk.f32.mxu1 %vm256_vm1, %v247_v33 }
  0x29   : > { %1249 = vmatprep.mubr.msk.f32.mxu0 %vm256_vm1, %v1104_v34  ;;  %1290 = vmatpush3.bf16.msra.mxu1 %v1287_v28 }
  0x2a   : > { %1306 = vmatpush3.bf16.msra.mxu0 %v1303_v30 }
  0x2b   : > { %1210 = vmatmul.mubr.msk.f32.gmra.mrb[4].mxu1 %vm256_vm1, %v248_v35 }
  0x2c   : > { %1250 = vmatmul.mubr.msk.f32.gmra.mrb[4].mxu0 %vm256_vm1, %v1105_v36  ;;  %1212 = vmatprep.mubr.msk.f32.mxu1 %vm256_vm1, %v249_v37 }
  0x2d   : > { %1252 = vmatprep.mubr.msk.f32.mxu0 %vm256_vm1, %v1106_v38 }
  0x2f   : > { %1213 = vmatmul.mubr.msk.f32.gmra.mrb[6].mxu1 %vm256_vm1, %v250_v39 }
  0x30   : > { %1253 = vmatmul.mubr.msk.f32.gmra.mrb[6].mxu0 %vm256_vm1, %v1107_v40  ;;  %1223 = vmatprep.mubr.msk.f32.mxu1 %vm256_vm1, %v231_v41 }
  0x31   : > { %1263 = vmatprep.mubr.msk.f32.mxu0 %vm256_vm1, %v244_v22 }
  0x33   : > { %1224 = vmatmul.mubr.msk.f32.vlgmr.msra.gmra.mrb[0].mxu1 %vm256_vm1, %v1100_v14 }
  0x34   : > { %1264 = vmatmul.mubr.msk.f32.vlgmr.msra.gmra.mrb[0].mxu0 %vm256_vm1, %v245_v27  ;;  %1226 = vmatprep.mubr.msk.f32.mxu1 %vm256_vm1, %v1101_v25 }
  0x35   : > { %1266 = vmatprep.mubr.msk.f32.mxu0 %vm256_vm1, %v246_v31 }
  0x37   : > { %1227 = vmatmul.mubr.msk.f32.gmra.mrb[2].mxu1 %vm256_vm1, %v1102_v29 }
  0x38   : > { %1267 = vmatmul.mubr.msk.f32.gmra.mrb[2].mxu0 %vm256_vm1, %v247_v33  ;;  %1229 = vmatprep.mubr.msk.f32.mxu1 %vm256_vm1, %v1103_v32 }
  0x39   : > { %1269 = vmatprep.mubr.msk.f32.mxu0 %vm256_vm1, %v248_v35 }
  0x3b   : > { %1230 = vmatmul.mubr.msk.f32.gmra.mrb[4].mxu1 %vm256_vm1, %v1104_v34 }
  0x3c   : > { %1270 = vmatmul.mubr.msk.f32.gmra.mrb[4].mxu0 %vm256_vm1, %v249_v37  ;;  %1232 = vmatprep.mubr.msk.f32.mxu1 %vm256_vm1, %v1105_v36 }
  0x3d   : > { %1272 = vmatprep.mubr.msk.f32.mxu0 %vm256_vm1, %v250_v39 }
  0x3f   : > { %1233 = vmatmul.mubr.msk.f32.gmra.mrb[6].mxu1 %vm256_vm1, %v1106_v38 }
  0x40   : > { %1273 = vmatmul.mubr.msk.f32.gmra.mrb[6].mxu0 %vm256_vm1, %v1127_v42 }
 0x106   : > { %v1225_v43 = vpop.f32.mrb[0].mxu1 }
 0x107   : > { %v1265_v44 = vpop.f32.mrb[0].mxu0  ;;  %v476_v45 = vpop.f32.mrb[1].mxu1 }
 0x108   : > { %v1591_v46 = vadd.f32 %v1265_v44, %v1225_v43  ;;  %v769_v47 = vpop.f32.mrb[1].mxu0 }
 0x109   : > { %v1593_v48 = vadd.f32 %v769_v47, %v476_v45 }
 0x10a   : > { %v1228_v49 = vpop.f32.mrb[2].mxu1  ;;  %v822_v5 = vsel (!%p1140_p9), %vm820_vm2, %v1591_v46, 0.0  ;;  %v847_v7 = vmul.f32 (!%p1140_p9), %v1591_v46, %v1591_v46 }
 0x10b   : > { %v1268_v50 = vpop.f32.mrb[2].mxu0  ;;  %v486_v51 = vpop.f32.mrb[3].mxu1  ;;  %v846_v3 = vmul.f32 (!%p1140_p9), %v1593_v48, %v1593_v48  ;;  %v821_v4 = vsel (!%p1140_p9), %vm820_vm2, %v1593_v48, 0.0 }
 0x10c   : > { %v1595_v52 = vadd.f32 %v1268_v50, %v1228_v49  ;;  %v779_v53 = vpop.f32.mrb[3].mxu0  ;;  %v823_v8 = vadd.f32 (!%p1140_p9), %v822_v5, %v821_v4  ;;  %v855_v16 = vsel (!%p1140_p9), %vm820_vm2, %v847_v7, 0.0 }
 0x10d   : > { %v1597_v54 = vadd.f32 %v779_v53, %v486_v51  ;;  %v854_v15 = vsel (!%p1140_p9), %vm820_vm2, %v846_v3, 0.0  ;;  %v819_v51 = vld [vmem:[#allocation2] sm:$0x1] (!%p1140_p9) }
 0x10e   : > { %v1231_v55 = vpop.f32.mrb[4].mxu1  ;;  %v826_v9 = vsel (!%p1140_p9), %vm820_vm2, %v1595_v52, 0.0  ;;  %v849_v11 = vmul.f32 (!%p1140_p9), %v1595_v52, %v1595_v52  ;;  %v856_v19 = vadd.f32 (!%p1140_p9), %v855_v16, %v854_v15 }
 0x10f   : > { %v1271_v56 = vpop.f32.mrb[4].mxu0  ;;  %v496_v57 = vpop.f32.mrb[5].mxu1  ;;  %818 = sbr.rel (%p1140_p9) target bundleno = 301 (0x12d), region = 48  ;;  %v824_v6 = vsel (!%p1140_p9), %vm820_vm2, %v1597_v54, 0.0  ;;  %v848_v10 = vmul.f32 (!%p1140_p9), %v1597_v54, %v1597_v54 }
 0x110   : > { %v1599_v58 = vadd.f32 %v1271_v56, %v1231_v55  ;;  %v789_v59 = vpop.f32.mrb[5].mxu0  ;;  %v825_v12 = vadd.f32 (!%p1140_p9), %v824_v6, %v823_v8  ;;  %v859_v22 = vsel (!%p1140_p9), %vm820_vm2, %v849_v11, 0.0 }
 0x111   : > { %v1601_v60 = vadd.f32 %v789_v59, %v496_v57  ;;  %v857_v17 = vsel (!%p1140_p9), %vm820_vm2, %v848_v10, 0.0  ;;  %v845_v59 = vld [vmem:[#allocation3] sm:$0x1] (!%p1140_p9) }
 0x112   : > { %v1234_v61 = vpop.f32.mrb[6].mxu1  ;;  %v827_v18 = vadd.f32 (!%p1140_p9), %v826_v9, %v825_v12  ;;  %v830_v20 = vsel (!%p1140_p9), %vm820_vm2, %v1599_v58, 0.0  ;;  %v851_v21 = vmul.f32 (!%p1140_p9), %v1599_v58, %v1599_v58  ;;  %v858_v24 = vadd.f32 (!%p1140_p9), %v857_v17, %v856_v19 }
 0x113   : > { %v1274_v62 = vpop.f32.mrb[6].mxu0  ;;  %v506_v63 = vpop.f32.mrb[7].mxu1  ;;  %v828_v13 = vsel (!%p1140_p9), %vm820_vm2, %v1601_v60, 0.0  ;;  %v850_v14 = vmul.f32 (!%p1140_p9), %v1601_v60, %v1601_v60 }
 0x114   : > { %v1603_v0 = vadd.f32 %v1274_v62, %v1234_v61  ;;  %v799_v1 = vpop.f32.mrb[7].mxu0  ;;  %v829_v23 = vadd.f32 (!%p1140_p9), %v828_v13, %v827_v18  ;;  %v860_v29 = vadd.f32 (!%p1140_p9), %v859_v22, %v858_v24  ;;  %v863_v32 = vsel (!%p1140_p9), %vm820_vm2, %v851_v21, 0.0 }
 0x115   : > { %v1605_v2 = vadd.f32 %v799_v1, %v506_v63  ;;  %v861_v27 = vsel (!%p1140_p9), %vm820_vm2, %v850_v14, 0.0 }
 0x116   : > { %v831_v28 = vadd.f32 %v830_v20, %v829_v23  ;;  %v834_v30 = vsel %vm820_vm2, %v1603_v0, 0.0  ;;  %v853_v31 = vmul.f32 %v1603_v0, %v1603_v0  ;;  %v862_v34 = vadd.f32 %v861_v27, %v860_v29 }
 0x117   : > { %v832_v25 = vsel %vm820_vm2, %v1605_v2, 0.0  ;;  %v852_v26 = vmul.f32 %v1605_v2, %v1605_v2 }
 0x118   : > { %v833_v33 = vadd.f32 %v832_v25, %v831_v28  ;;  %v864_v37 = vadd.f32 %v863_v32, %v862_v34  ;;  %v867_v38 = vsel %vm820_vm2, %v853_v31, 0.0 }
 0x119   : > { %v865_v35 = vsel %vm820_vm2, %v852_v26, 0.0 }
 0x11a   : > { %v835_v36 = vadd.f32 %v834_v30, %v833_v33  ;;  %v866_v40 = vadd.f32 %v865_v35, %v864_v37 }
 0x11c   : > { %v836_v39 = vrot.slane %v835_v36, 4  ;;  %v868_v42 = vadd.f32 %v867_v38, %v866_v40 }
 0x11e   : > { %v837_v41 = vadd.f32 %v836_v39, %v835_v36  ;;  %v869_v44 = vrot.slane %v868_v42, 4 }
 0x120   : > { %v838_v43 = vrot.slane %v837_v41, 2  ;;  %v870_v47 = vadd.f32 %v869_v44, %v868_v42 }
 0x122   : > { %v839_v45 = vadd.f32 %v838_v43, %v837_v41  ;;  %v871_v50 = vrot.slane %v870_v47, 2 }
 0x124   : > { %v840_v49 = vrot.slane %v839_v45, 1  ;;  %v872_v55 = vadd.f32 %v871_v50, %v870_v47 }
 0x126   : > { %v841_v53 = vadd.f32 %v840_v49, %v839_v45  ;;  %v873_v57 = vrot.slane %v872_v55, 1 }
 0x128   : > { %v842_v56 = vadd.f32 %v841_v53, %v819_v51  ;;  %v874_v61 = vadd.f32 %v873_v57, %v872_v55 }
 0x12a   : > { %844 = vst.msk [vmem:[#allocation2] sm:$0x1] %vm843_vm3, %v842_v56  ;;  %v875_v62 = vadd.f32 %v874_v61, %v845_v59 }
 0x12c   : > { %876 = vst.msk [vmem:[#allocation3] sm:$0x1] %vm843_vm3, %v875_v62 }
 0x12d PF: > { %p1141_p10 = scmp.ne.s32.totalorder %s1405_s19, 1 }
 0x12e   : > { %v889_v5 = vlaneseq (!%p1141_p10)  ;;  %vm988_vm4 = vcmask (!%p1141_p10), 130048   ;;  %v972_v33 = vld [vmem:[%s1718_s4] sm:$0xff] (!%p1141_p10)  ;;  %v974_v37 = vld [vmem:[%s1718_s4 + $0x10] sm:$0xff] (!%p1141_p10)  ;;  %v973_v38 = vld [vmem:[%s1718_s4 + $0x8] sm:$0xff] (!%p1141_p10)  ;;  %s1032_s28 = scalar_lea.vmem (!%p1141_p10), %s1719_s5, %s1401_s18  ;;  %vm1033_vm13 = vcmask (!%p1141_p10), 0  }
 0x12f   : > { %880 = sbr.rel (%p1141_p10) target bundleno = 538 (0x21a), region = 52  ;;  %v975_v39 = vld [vmem:[%s1718_s4 + $0x18] sm:$0xff] (!%p1141_p10)  ;;  %v976_v61 = vld [vmem:[%s1718_s4 + $0x20] sm:$0xff] (!%p1141_p10) }
 0x130   : > { %v890_v8 = vshrl.u32 (!%p1141_p10), %v889_v5, 7 }
 0x131   : > { %v881_v63 = vld [vmem:[#allocation2] sm:$0x1] (!%p1141_p10) }
 0x132   : > { %v883_v3 = vmul.f32 (!%p1141_p10), 0.0078125, %v881_v63  ;;  %v891_v10 = vsub.s32 (!%p1141_p10), 0, %v890_v8 }
 0x133   : > { %v884_v1 = vld [vmem:[#allocation3] sm:$0x1] (!%p1141_p10) }
 0x134   : > { %v885_v4 = vmul.f32 (!%p1141_p10), 0.0078125, %v884_v1  ;;  %v886_v6 = vmul.f32 (!%p1141_p10), %v883_v3, %v883_v3  ;;  %v892_v11 = vrot.slane (!%p1141_p10), %v883_v3, %v891_v10 }
 0x136   : > { %v887_v7 = vsub.f32 %v885_v4, %v886_v6  ;;  %v894_v12 = vsub.f32 %v1593_v48, %v892_v11  ;;  %v896_v13 = vsub.f32 %v1597_v54, %v892_v11  ;;  %v895_v14 = vsub.f32 %v1591_v46, %v892_v11  ;;  %v1142_v48 = vld [vmem:[%s1716_s2] ss:$0 sm:$0xff]  ;;  %v977_v6 = vld [vmem:[%s1718_s4 + $0x28] sm:$0xff] }
 0x137   : > { %v897_v15 = vsub.f32 %v1595_v52, %v892_v11  ;;  %v898_v17 = vsub.f32 %v1601_v60, %v892_v11  ;;  %v899_v18 = vsub.f32 %v1599_v58, %v892_v11  ;;  %v900_v19 = vsub.f32 %v1605_v2, %v892_v11  ;;  %v1143_v52 = vld [vmem:[%s1717_s3] ss:$0 sm:$0xff] }
 0x138   : > { %v902_v9 = vadd.f32 1e-05, %v887_v7  ;;  %v901_v20 = vsub.f32 %v1603_v0, %v892_v11 }
 0x13a   : > { %1373 = vrsqrt.f32 %v902_v9 }
 0x144   : > { %v1374_v16 = vpop.eup %1373 }
 0x145   : > { %v908_v21 = vrot.slane %v1374_v16, %v891_v10  ;;  %v979_v16 = vld [vmem:[%s1718_s4 + $0x38] sm:$0xff] }
 0x147   : > { %v910_v22 = vmul.f32 %v908_v21, %v894_v12  ;;  %v912_v54 = vmul.f32 %v908_v21, %v896_v13  ;;  %v911_v46 = vmul.f32 %v908_v21, %v895_v14  ;;  %v913_v23 = vmul.f32 %v908_v21, %v897_v15  ;;  %v978_v15 = vld [vmem:[%s1718_s4 + $0x30] sm:$0xff] }
 0x148   : > { %v914_v60 = vmul.f32 %v908_v21, %v898_v17  ;;  %v915_v58 = vmul.f32 %v908_v21, %v899_v18  ;;  %v916_v24 = vmul.f32 %v908_v21, %v900_v19  ;;  %v917_v2 = vmul.f32 %v908_v21, %v901_v20 }
 0x149   : > { %v925_v25 = vmul.f32 %v1142_v48, %v910_v22  ;;  %v927_v0 = vmul.f32 %v1142_v48, %v912_v54  ;;  %v926_v26 = vmul.f32 %v1142_v48, %v911_v46  ;;  %v928_v27 = vmul.f32 %v1142_v48, %v913_v23 }
 0x14a   : > { %v929_v28 = vmul.f32 %v1142_v48, %v914_v60  ;;  %v930_v29 = vmul.f32 %v1142_v48, %v915_v58  ;;  %v931_v30 = vmul.f32 %v1142_v48, %v916_v24  ;;  %v932_v31 = vmul.f32 %v1142_v48, %v917_v2 }
 0x14b   : > { %v940_v32 = vadd.f32 %v1143_v52, %v925_v25  ;;  %v942_v34 = vadd.f32 %v1143_v52, %v927_v0  ;;  %v941_v35 = vadd.f32 %v1143_v52, %v926_v26  ;;  %v943_v36 = vadd.f32 %v1143_v52, %v928_v27 }
 0x14c   : > { %v944_v40 = vadd.f32 %v1143_v52, %v929_v28  ;;  %v945_v41 = vadd.f32 %v1143_v52, %v930_v29  ;;  %v946_v42 = vadd.f32 %v1143_v52, %v931_v30  ;;  %v947_v43 = vadd.f32 %v1143_v52, %v932_v31 }
 0x14d   : > { %vm948_vm5 = vcmp.gt.f32.partialorder %v940_v32, 0.0  ;;  %v956_v44 = vmul.f32 0.2, %v940_v32  ;;  %vm950_vm6 = vcmp.gt.f32.partialorder %v942_v34, 0.0  ;;  %v958_v45 = vmul.f32 0.2, %v942_v34 }
 0x14e   : > { %vm949_vm7 = vcmp.gt.f32.partialorder %v941_v35, 0.0  ;;  %v957_v47 = vmul.f32 0.2, %v941_v35  ;;  %vm951_vm8 = vcmp.gt.f32.partialorder %v943_v36, 0.0  ;;  %v959_v49 = vmul.f32 0.2, %v943_v36 }
 0x14f   : > { %v964_v50 = vsel %vm948_vm5, %v940_v32, %v956_v44  ;;  %v966_v51 = vsel %vm950_vm6, %v942_v34, %v958_v45  ;;  %vm952_vm9 = vcmp.gt.f32.partialorder %v944_v40, 0.0  ;;  %v960_v53 = vmul.f32 0.2, %v944_v40 }
 0x150   : > { %v980_v55 = vmul.f32 %v972_v33, %v964_v50  ;;  %v982_v56 = vmul.f32 %v974_v37, %v966_v51  ;;  %v965_v57 = vsel %vm949_vm7, %v941_v35, %v957_v47  ;;  %v967_v59 = vsel %vm951_vm8, %v943_v36, %v959_v49 }
 0x151   : > { %v981_v62 = vmul.f32 %v973_v38, %v965_v57  ;;  %v983_v63 = vmul.f32 %v975_v39, %v967_v59  ;;  %v968_v1 = vsel %vm952_vm9, %v944_v40, %v960_v53  ;;  %vm953_vm10 = vcmp.gt.f32.partialorder %v945_v41, 0.0 }
 0x152   : > { %v989_v3 = vsel %vm988_vm4, %v980_v55, 0.0  ;;  %v995_v4 = vsel %vm988_vm4, %v982_v56, 0.0  ;;  %v961_v5 = vmul.f32 0.2, %v945_v41  ;;  %v984_v8 = vmul.f32 %v976_v61, %v968_v1 }
 0x153   : > { %990 = vadd.xlane.f32.xlu0 %v989_v3  ;;  %996 = vadd.xlane.f32.xlu1 %v995_v4  ;;  %v992_v7 = vsel %vm988_vm4, %v981_v62, 0.0  ;;  %vm954_vm11 = vcmp.gt.f32.partialorder %v946_v42, 0.0  ;;  %v962_v9 = vmul.f32 0.2, %v946_v42  ;;  %v998_v10 = vsel %vm988_vm4, %v983_v63, 0.0 }
 0x154   : > { %v969_v11 = vsel %vm953_vm10, %v945_v41, %v961_v5  ;;  %vm955_vm12 = vcmp.gt.f32.partialorder %v947_v43, 0.0  ;;  %v963_v12 = vmul.f32 0.2, %v947_v43  ;;  %v1001_v18 = vsel %vm988_vm4, %v984_v8, 0.0 }
 0x155   : > { %v985_v13 = vmul.f32 %v977_v6, %v969_v11  ;;  %v970_v14 = vsel %vm954_vm11, %v946_v42, %v962_v9 }
 0x156   : > { %v971_v17 = vsel %vm955_vm12, %v947_v43, %v963_v12  ;;  %v986_v20 = vmul.f32 %v978_v15, %v970_v14 }
 0x157   : > { %993 = vadd.xlane.f32.xlu0 %v992_v7  ;;  %999 = vadd.xlane.f32.xlu1 %v998_v10  ;;  %v1004_v19 = vsel %vm988_vm4, %v985_v13, 0.0  ;;  %v987_v21 = vmul.f32 %v979_v16, %v971_v17 }
 0x158   : > { %v1007_v48 = vsel %vm988_vm4, %v986_v20, 0.0 }
 0x159   : > { %v1010_v22 = vsel %vm988_vm4, %v987_v21, 0.0 }
 0x15b   : > { %1002 = vadd.xlane.f32.xlu0 %v1001_v18  ;;  %1005 = vadd.xlane.f32.xlu1 %v1004_v19 }
 0x15f   : > { %1008 = vadd.xlane.f32.xlu0 %v1007_v48  ;;  %1011 = vadd.xlane.f32.xlu1 %v1010_v22 }
 0x1e0   : > { %v991_v54 = vpop.xlane.xlu0 %990  ;;  %v997_v46 = vpop.xlane.xlu1 %996 }
 0x1e4   : > { %v994_v23 = vpop.xlane.xlu0 %993  ;;  %v1000_v52 = vpop.xlane.xlu1 %999 }
 0x1e5   : > { %v1013_v60 = vadd.f32 %v994_v23, %v991_v54 }
 0x1e7   : > { %v1014_v58 = vadd.f32 %v1013_v60, %v997_v46 }
 0x1e8   : > { %v1003_v24 = vpop.xlane.xlu0 %1002  ;;  %v1006_v2 = vpop.xlane.xlu1 %1005 }
 0x1e9   : > { %v1015_v25 = vadd.f32 %v1014_v58, %v1000_v52 }
 0x1eb   : > { %v1016_v0 = vadd.f32 %v1015_v25, %v1003_v24 }
 0x1ec   : > { %v1009_v26 = vpop.xlane.xlu0 %1008  ;;  %v1012_v28 = vpop.xlane.xlu1 %1011 }
 0x1ed   : > { %v1017_v27 = vadd.f32 %v1016_v0, %v1006_v2 }
 0x1ef   : > { %v1018_v29 = vadd.f32 %v1017_v27, %v1009_v26 }
 0x1f1   : > { %v1019_v30 = vadd.f32 %v1018_v29, %v1012_v28 }
 0x1f3   : > { %v1020_v31 = vrot.slane %v1019_v30, 4 }
 0x1f5   : > { %v1021_v32 = vadd.f32 %v1020_v31, %v1019_v30 }
 0x1f7   : > { %v1022_v33 = vrot.slane %v1021_v32, 2 }
 0x1f9   : > { %v1023_v34 = vadd.f32 %v1022_v33, %v1021_v32 }
 0x1fb   : > { %v1024_v35 = vrot.slane %v1023_v34, 1 }
 0x1fd   : > { %v1025_v36 = vadd.f32 %v1024_v35, %v1023_v34 }
 0x1ff   : > { %v1144_v37 = vmul.f32 -1.442695, %v1025_v36 }
 0x201   : > { %1375 = vpow2.f32 %v1144_v37 }
 0x20b   : > { %v1376_v38 = vpop.eup %1375 }
 0x20c   : > { %v1029_v39 = vadd.f32 1.0, %v1376_v38 }
 0x20e   : > { %1377 = vrcp.f32 %v1029_v39 }
 0x218   : > { %v1378_v40 = vpop.eup %1377 }
 0x219   : > { %1034 = vst.msk [vmem:[%s1032_s28] sm:$0x1] %vm1033_vm13, %v1378_v40 }
 0x21a PF: > { %s15_s22 = sadd.s32 1, %s1417_s22   ;;  %s1720_s18 = smov %s1409_s20 }
 0x21b   : > { %p12_p11 = scmp.ge.s32.totalorder %s15_s22, 6   ;;  %s1721_s19 = smov %s1413_s21 }
 0x21c   : > { %s1722_s20 = smov %s1725_s23  ;;  %s1723_s21 = smov %s1729_s24 }
 0x21d   :  { %14 = sbr.rel (!%p12_p11) target bundleno = 3 (0x3), region = 83 }

</bundles_post_ra>
